<compile_context>
chip_gen: v7x
topology: tpu7x:2x2x1
jax: 0.10.0
libtpu: 0.0.40
codegen_flags: <defaults>
</compile_context>

<pallas_src>
import functools

import jax
import jax.numpy as jnp
from jax import lax
from jax.experimental import pallas as pl
from jax.experimental.pallas import tpu as pltpu

EPS = 1e-5
LANE = 128

TAPS9 = tuple((kh, kw) for kh in range(3) for kw in range(3))
TAPS_NC = tuple(t for t in TAPS9 if t != (1, 1))          # non-centre taps


def _round_up(x, m):
    return (x + m - 1) // m * m


def _vmem_limit_bytes():
    # Derive the scoped-VMEM budget per generation (v5e default is only 16 MiB scoped,
    # v7x has 64 MiB physical); fall back to a value that is safe everywhere.
    try:
        cap = getattr(pltpu.get_tpu_info(), "vmem_capacity_bytes", None)
        if cap:
            return int(cap) * 3 // 4
    except Exception:
        pass
    return 48 * 1024 * 1024


def _compiler_params():
    return pltpu.CompilerParams(dimension_semantics=("parallel",),
                                vmem_limit_bytes=_vmem_limit_bytes())


# ----------------------------- Pallas kernels ------------------------------

def _tap_origin(kh, kw, s, hps, wps):
    # Row/col of tap (kh, kw) inside the stride-phase-split padded image.
    return (kh % s) * hps + kh // s, (kw % s) * wps + kw // s


def _conv1_shortcut_kernel(x_ref, wt_ref, wc_ref, y_ref, ye_ref, st_ref,
                           *, stride, hps, wps, hout, wout, cinp, cpad):
    """3x3 conv (stride s) + fused 1x1 shortcut + per-image BN batch-stat partial sums.

    im2col happens in-kernel: the padded, phase-split image block stays in VMEM and each
    tap is a unit-stride static slice feeding one MXU dot (f32 accumulate).
    """
    x = x_ref[0]                                           # (s*hps, s*wps, cinp)
    mimg = hout * wout
    acc = jnp.zeros((mimg, cpad), jnp.float32)
    for t, (kh, kw) in enumerate(TAPS_NC):
        r0, c0 = _tap_origin(kh, kw, stride, hps, wps)
        lhs = x[r0:r0 + hout, c0:c0 + wout, :].reshape(mimg, cinp)
        acc = acc + jnp.dot(lhs, wt_ref[t], preferred_element_type=jnp.float32)

    # Centre tap: combined [W1_centre | W_shortcut] -> one dot fills 2*Cpad MXU columns
    # (good for the 256-wide v6e/v7x MXU) and yields the 1x1 shortcut for free, since the
    # 1x1 stride-s conv input IS the centre tap.
    r0, c0 = _tap_origin(1, 1, stride, hps, wps)
    lhs = x[r0:r0 + hout, c0:c0 + wout, :].reshape(mimg, cinp)
    both = jnp.dot(lhs, wc_ref[...], preferred_element_type=jnp.float32)
    acc = acc + both[:, :cpad]
    ye = both[:, cpad:]

    y_ref[0] = acc
    ye_ref[0] = ye
    # Per-image partial sums (rows: sum(y1), sum(y1^2), sum(ye), sum(ye^2)); reduced over
    # the batch in JAX so this kernel keeps "parallel" grid semantics (v7x megacore).
    st_ref[0] = jnp.concatenate(
        [jnp.sum(acc, axis=0, keepdims=True),
         jnp.sum(acc * acc, axis=0, keepdims=True),
         jnp.sum(ye, axis=0, keepdims=True),
         jnp.sum(ye * ye, axis=0, keepdims=True),
         jnp.zeros((4, cpad), jnp.float32)], axis=0)


def _conv2_kernel(x_ref, wt_ref, sc_ref, sh_ref, y_ref, st_ref,
                  *, hout, wout, cpad, hp, wp):
    """3x3 conv (stride 1) over relu(bn1(y1)), with BN1+ReLU fused into the input path."""
    x = x_ref[0]                                           # (hp, wp, cpad) raw conv1 out
    # Fused BN1 + ReLU; then re-zero the conv padding border (BN(0) != 0).
    hio = lax.broadcasted_iota(jnp.int32, (hp, wp, 1), 0)
    wio = lax.broadcasted_iota(jnp.int32, (hp, wp, 1), 1)
    interior = (hio >= 1) & (hio <= hp - 2) & (wio >= 1) & (wio <= wp - 2)
    act = jnp.maximum(x * sc_ref[...] + sh_ref[...], 0.0)
    act = jnp.where(interior, act, 0.0)

    mimg = hout * wout
    acc = jnp.zeros((mimg, cpad), jnp.float32)
    for t, (kh, kw) in enumerate(TAPS9):
        lhs = act[kh:kh + hout, kw:kw + wout, :].reshape(mimg, cpad)
        acc = acc + jnp.dot(lhs, wt_ref[t], preferred_element_type=jnp.float32)

    y_ref[0] = acc
    st_ref[0] = jnp.concatenate(
        [jnp.sum(acc, axis=0, keepdims=True),
         jnp.sum(acc * acc, axis=0, keepdims=True),
         jnp.zeros((6, cpad), jnp.float32)], axis=0)


def _dual_bn_add_relu_kernel(y_ref, e_ref, sc2_ref, sh2_ref, sce_ref, she_ref, o_ref):
    """Fused BN2(main) + BN(shortcut) + residual add + ReLU (lane-dense 2D tiles)."""
    main = y_ref[...] * sc2_ref[...] + sh2_ref[...]
    short = e_ref[...] * sce_ref[...] + she_ref[...]
    o_ref[...] = jnp.maximum(main + short, 0.0)


# ----------------------------- Pallas wrappers ------------------------------

def _const_spec(shape):
    return pl.BlockSpec(shape, lambda i: (0,) * len(shape))


def conv1_shortcut_pallas(xph, w_taps, w_centre, *, stride, hps, wps, hout, wout, cpad):
    n, hh, ww, cinp = xph.shape
    mimg = hout * wout
    kernel = functools.partial(_conv1_shortcut_kernel, stride=stride, hps=hps, wps=wps,
                               hout=hout, wout=wout, cinp=cinp, cpad=cpad)
    act = jax.ShapeDtypeStruct((n, mimg, cpad), jnp.float32)
    stat = jax.ShapeDtypeStruct((n, 8, cpad), jnp.float32)
    return pl.pallas_call(
        kernel,
        out_shape=(act, act, stat),
        grid=(n,),
        in_specs=[pl.BlockSpec((1, hh, ww, cinp), lambda i: (i, 0, 0, 0)),
                  _const_spec(w_taps.shape),
                  _const_spec(w_centre.shape)],
        out_specs=(pl.BlockSpec((1, mimg, cpad), lambda i: (i, 0, 0)),
                   pl.BlockSpec((1, mimg, cpad), lambda i: (i, 0, 0)),
                   pl.BlockSpec((1, 8, cpad), lambda i: (i, 0, 0))),
        compiler_params=_compiler_params(),
    )(xph, w_taps, w_centre)


def conv2_pallas(y1p, w_taps, sc1, sh1, *, hout, wout, cpad):
    n, hp, wp, _ = y1p.shape
    mimg = hout * wout
    kernel = functools.partial(_conv2_kernel, hout=hout, wout=wout, cpad=cpad,
                               hp=hp, wp=wp)
    return pl.pallas_call(
        kernel,
        out_shape=(jax.ShapeDtypeStruct((n, mimg, cpad), jnp.float32),
                   jax.ShapeDtypeStruct((n, 8, cpad), jnp.float32)),
        grid=(n,),
        in_specs=[pl.BlockSpec((1, hp, wp, cpad), lambda i: (i, 0, 0, 0)),
                  _const_spec(w_taps.shape),
                  _const_spec(sc1.shape),
                  _const_spec(sh1.shape)],
        out_specs=(pl.BlockSpec((1, mimg, cpad), lambda i: (i, 0, 0)),
                   pl.BlockSpec((1, 8, cpad), lambda i: (i, 0, 0))),
        compiler_params=_compiler_params(),
    )(y1p, w_taps, sc1, sh1)


def dual_bn_add_relu_pallas(y, e, sc2, sh2, sce, she, tm):
    mp, cpad = y.shape
    row = pl.BlockSpec((tm, cpad), lambda i: (i, 0))
    return pl.pallas_call(
        _dual_bn_add_relu_kernel,
        out_shape=jax.ShapeDtypeStruct((mp, cpad), jnp.float32),
        grid=(mp // tm,),
        in_specs=[row, row,
                  _const_spec((1, cpad)), _const_spec((1, cpad)),
                  _const_spec((1, cpad)), _const_spec((1, cpad))],
        out_specs=row,
        compiler_params=_compiler_params(),
    )(y, e, sc2, sh2, sce, she)


# ------------------------------- glue (JAX) ---------------------------------

def _phase_split_pad(x_nhwc, s, cinp):
    """conv pad=1 + channel pad + stride-phase regroup.

    result[n, p*Hps + a, q*Wps + b, c] == xpad[n, a*s + p, b*s + q, c], so every 3x3 tap
    becomes a unit-stride static slice inside the kernel even for stride > 1.
    """
    n, h, w, c = x_nhwc.shape
    hp, wp = h + 2, w + 2
    hps, wps = -(-hp // s), -(-wp // s)
    xp = jnp.pad(x_nhwc, ((0, 0), (1, 1 + hps * s - hp), (1, 1 + wps * s - wp),
                          (0, cinp - c)))
    xr = xp.reshape(n, hps, s, wps, s, cinp).transpose(0, 2, 1, 4, 3, 5)
    return xr.reshape(n, s * hps, s * wps, cinp), hps, wps


def _tap_weight(w_oihw, kh, kw, rows, cols):
    # OIHW tap -> (Cin, Cout), zero-padded to (rows, cols) for aligned MXU feeds.
    wt = w_oihw[:, :, kh, kw].T
    return jnp.pad(wt, ((0, rows - wt.shape[0]), (0, cols - wt.shape[1])))


def _pad_vec(v, cpad):
    return jnp.pad(v.reshape(1, -1), ((0, 0), (0, cpad - v.shape[0])))


def _bn_scale_shift(s, q, m_true, gamma_pad, beta_pad):
    # Batch statistics (biased variance, matching PyTorch BN normalization).
    mean = s / m_true
    var = jnp.maximum(q / m_true - mean * mean, 0.0)
    scale = gamma_pad * lax.rsqrt(var + EPS)
    shift = beta_pad - mean * scale
    return scale, shift


def _tile(m, cap=1024):
    tm = min(cap, _round_up(m, 8))
    return tm, _round_up(m, tm)


# --------------------------- RestNetDownBlock -------------------------------

def init_params(key, in_channels, out_channels):
    k1, k2, k3, k4, k5, k6 = jax.random.split(key, 6)
    return {
        "w1": 0.1 * jax.random.normal(k1, (out_channels, in_channels, 3, 3), jnp.float32),
        "b1": 0.1 * jax.random.normal(k2, (out_channels,), jnp.float32),
        "w2": 0.1 * jax.random.normal(k3, (out_channels, out_channels, 3, 3), jnp.float32),
        "b2": 0.1 * jax.random.normal(k4, (out_channels,), jnp.float32),
        "we": 0.1 * jax.random.normal(k5, (out_channels, in_channels, 1, 1), jnp.float32),
        "be": 0.1 * jax.random.normal(k6, (out_channels,), jnp.float32),
        # BatchNorm affine params (PyTorch default init: weight=1, bias=0)
        "g1": jnp.ones((out_channels,), jnp.float32),
        "beta1": jnp.zeros((out_channels,), jnp.float32),
        "g2": jnp.ones((out_channels,), jnp.float32),
        "beta2": jnp.zeros((out_channels,), jnp.float32),
        "ge": jnp.ones((out_channels,), jnp.float32),
        "betae": jnp.zeros((out_channels,), jnp.float32),
    }


@functools.partial(jax.jit, static_argnames=("stride",))
def restnet_down_block(x_nchw, params, stride):
    # NCHW in / NCHW out (PyTorch layout); compute in NHWC / (M, Cpad) inside Pallas.
    x = jnp.transpose(x_nchw, (0, 2, 3, 1)).astype(jnp.float32)
    n, h, w, cin = x.shape
    cout = params["w1"].shape[0]
    cpad = _round_up(cout, LANE)
    cinp = _round_up(cin, 8)
    s0, s1 = stride
    if s1 != 1:
        # The residual add itself requires matching spatial shapes => stride[1] == 1.
        raise NotImplementedError("RestNetDownBlock kernel requires stride[1] == 1")

    h1o = (h + 2 - 3) // s0 + 1
    w1o = (w + 2 - 3) // s0 + 1
    m1 = n * h1o * w1o

    # ---- conv1 (+ fused 1x1 shortcut) with in-kernel im2col --------------------
    xph, hps, wps = _phase_split_pad(x, s0, cinp)
    w_taps1 = jnp.stack([_tap_weight(params["w1"], kh, kw, cinp, cpad)
                         for kh, kw in TAPS_NC])
    w_centre = jnp.concatenate([_tap_weight(params["w1"], 1, 1, cinp, cpad),
                                _tap_weight(params["we"], 0, 0, cinp, cpad)], axis=1)
    y1, ye, st1 = conv1_shortcut_pallas(xph, w_taps1, w_centre, stride=s0,
                                        hps=hps, wps=wps, hout=h1o, wout=w1o, cpad=cpad)

    # BN1 scale/shift from fused batch stats (conv biases cancel through batch-stat BN).
    g1 = _pad_vec(params["g1"], cpad); bt1 = _pad_vec(params["beta1"], cpad)
    sc1, sh1 = _bn_scale_shift(st1[:, 0:1, :].sum(0), st1[:, 1:2, :].sum(0), m1, g1, bt1)

    # ---- conv2 with BN1 + ReLU fused into its input path (no h1 HBM round trip) ----
    y1p = jnp.pad(y1.reshape(n, h1o, w1o, cpad), ((0, 0), (1, 1), (1, 1), (0, 0)))
    w_taps2 = jnp.stack([_tap_weight(params["w2"], kh, kw, cpad, cpad)
                         for kh, kw in TAPS9])
    y2, st2 = conv2_pallas(y1p, w_taps2,
                           sc1.reshape(1, 1, cpad), sh1.reshape(1, 1, cpad),
                           hout=h1o, wout=w1o, cpad=cpad)
    h2o, w2o = h1o, w1o
    m2 = n * h2o * w2o

    # ---- fused epilogue: BN2(main) + BN(shortcut) + add + ReLU ------------------
    g2 = _pad_vec(params["g2"], cpad); bt2 = _pad_vec(params["beta2"], cpad)
    ge = _pad_vec(params["ge"], cpad); bte = _pad_vec(params["betae"], cpad)
    sc2, sh2 = _bn_scale_shift(st2[:, 0:1, :].sum(0), st2[:, 1:2, :].sum(0), m2, g2, bt2)
    sce, she = _bn_scale_shift(st1[:, 2:3, :].sum(0), st1[:, 3:4, :].sum(0), m1, ge, bte)

    tm, mp = _tile(m2)
    y2f = jnp.pad(y2.reshape(m2, cpad), ((0, mp - m2), (0, 0)))
    yef = jnp.pad(ye.reshape(m1, cpad), ((0, mp - m2), (0, 0)))
    out = dual_bn_add_relu_pallas(y2f, yef, sc2, sh2, sce, she, tm)

    out = out[:m2, :cout].reshape(n, h2o, w2o, cout)
    return jnp.transpose(out, (0, 3, 1, 2))


# ------------------------------- reference ----------------------------------

def reference(x, p, stride):
    def conv(x, w, b, s, pad):
        y = lax.conv_general_dilated(
            x, w, (s, s), [(pad, pad), (pad, pad)],
            dimension_numbers=("NCHW", "OIHW", "NCHW"),
            precision=lax.Precision.HIGHEST)
        return y + b[None, :, None, None]

    def bn(x, g, bta):
        m = jnp.mean(x, axis=(0, 2, 3), keepdims=True)
        v = jnp.mean((x - m) ** 2, axis=(0, 2, 3), keepdims=True)
        return (x - m) * lax.rsqrt(v + EPS) * g[None, :, None, None] \
            + bta[None, :, None, None]

    extra = bn(conv(x, p["we"], p["be"], stride[0], 0), p["ge"], p["betae"])
    h = jnp.maximum(bn(conv(x, p["w1"], p["b1"], stride[0], 1), p["g1"], p["beta1"]), 0.0)
    h = bn(conv(h, p["w2"], p["b2"], stride[1], 1), p["g2"], p["beta2"])
    return jnp.maximum(extra + h, 0.0)


if __name__ == "__main__":
    key = jax.random.PRNGKey(0)
    kx, kp = jax.random.split(key)

    in_channels, out_channels = 4, 8
    stride = (2, 1)  # RestNetDownBlock(in, out, stride=[2, 1])
    x = jax.random.normal(kx, (2, in_channels, 16, 16), jnp.float32)
    params = init_params(kp, in_channels, out_channels)

    y = restnet_down_block(x, params, stride)
    y = jax.block_until_ready(y)
    assert y.shape == (2, out_channels, 8, 8), y.shape

    y_ref = reference(x, params, stride)
    assert jnp.allclose(y, y_ref, atol=1e-3, rtol=1e-3), \
        float(jnp.max(jnp.abs(y - y_ref)))

    print("KERNEL_OK")
</pallas_src>

<mosaic_0001>
module attributes {stable_mosaic.version = 11 : i64} {
  func.func @_conv1_shortcut_kernel(%arg0: i32, %arg1: memref<1x18x18x8xf32, #tpu.memory_space<vmem>>, %arg2: memref<8x8x128xf32, #tpu.memory_space<vmem>>, %arg3: memref<8x256xf32, #tpu.memory_space<vmem>>, %arg4: memref<1x64x128xf32, #tpu.memory_space<vmem>>, %arg5: memref<1x64x128xf32, #tpu.memory_space<vmem>>, %arg6: memref<1x8x128xf32, #tpu.memory_space<vmem>>) attributes {dimension_semantics = [#tpu.dimension_semantics<parallel>], iteration_bounds = array<i64: 2>, scalar_prefetch = 0 : i64, scratch_operands = 0 : i64, tpu.core_type = #tpu.core_type<tc>, window_params = [{transform_indices = @transform_0, window_bounds = array<i64: 1, 18, 18, 8>}, {pipeline_mode = #tpu.pipeline_mode<synchronous>, transform_indices = @transform_1, window_bounds = array<i64: 8, 8, 128>}, {pipeline_mode = #tpu.pipeline_mode<synchronous>, transform_indices = @transform_2, window_bounds = array<i64: 8, 256>}, {transform_indices = @transform_3, window_bounds = array<i64: 1, 64, 128>}, {transform_indices = @transform_4, window_bounds = array<i64: 1, 64, 128>}, {transform_indices = @transform_5, window_bounds = array<i64: 1, 8, 128>}]} {
    %c0 = arith.constant 0 : index
    %c0_0 = arith.constant 0 : index
    %c0_1 = arith.constant 0 : index
    %c0_2 = arith.constant 0 : index
    %0 = vector.load %arg1[%c0, %c0_0, %c0_1, %c0_2] : memref<1x18x18x8xf32, #tpu.memory_space<vmem>>, vector<1x18x18x8xf32>
    %1 = vector.shape_cast %0 : vector<1x18x18x8xf32> to vector<18x18x8xf32>
    %cst = arith.constant 0.000000e+00 : f32
    %2 = vector.broadcast %cst : f32 to vector<64x128xf32>
    %3 = vector.extract_strided_slice %1 {offsets = [0, 0, 0], sizes = [8, 8, 8], strides = [1, 1, 1]} : vector<18x18x8xf32> to vector<8x8x8xf32>
    %4 = vector.shape_cast %3 : vector<8x8x8xf32> to vector<64x8xf32>
    %c0_3 = arith.constant 0 : index
    %c0_4 = arith.constant 0 : index
    %c0_5 = arith.constant 0 : index
    %5 = vector.load %arg2[%c0_3, %c0_4, %c0_5] : memref<8x8x128xf32, #tpu.memory_space<vmem>>, vector<1x8x128xf32>
    %6 = vector.shape_cast %5 : vector<1x8x128xf32> to vector<8x128xf32>
    %cst_6 = arith.constant dense<0.000000e+00> : vector<64x128xf32>
    %7 = tpu.matmul %4, %6, %cst_6 {dimension_numbers = #tpu.dot_dimension_numbers<[1], [0], [0], [1], [0, 0, 1, 1], [], []>} : vector<64x8xf32>, vector<8x128xf32>, vector<64x128xf32> -> vector<64x128xf32>
    %8 = arith.addf %2, %7 : vector<64x128xf32>
    %9 = vector.extract_strided_slice %1 {offsets = [0, 9, 0], sizes = [8, 8, 8], strides = [1, 1, 1]} : vector<18x18x8xf32> to vector<8x8x8xf32>
    %10 = vector.shape_cast %9 : vector<8x8x8xf32> to vector<64x8xf32>
    %c1 = arith.constant 1 : index
    %c0_7 = arith.constant 0 : index
    %c0_8 = arith.constant 0 : index
    %11 = vector.load %arg2[%c1, %c0_7, %c0_8] : memref<8x8x128xf32, #tpu.memory_space<vmem>>, vector<1x8x128xf32>
    %12 = vector.shape_cast %11 : vector<1x8x128xf32> to vector<8x128xf32>
    %cst_9 = arith.constant dense<0.000000e+00> : vector<64x128xf32>
    %13 = tpu.matmul %10, %12, %cst_9 {dimension_numbers = #tpu.dot_dimension_numbers<[1], [0], [0], [1], [0, 0, 1, 1], [], []>} : vector<64x8xf32>, vector<8x128xf32>, vector<64x128xf32> -> vector<64x128xf32>
    %14 = arith.addf %8, %13 : vector<64x128xf32>
    %15 = vector.extract_strided_slice %1 {offsets = [0, 1, 0], sizes = [8, 8, 8], strides = [1, 1, 1]} : vector<18x18x8xf32> to vector<8x8x8xf32>
    %16 = vector.shape_cast %15 : vector<8x8x8xf32> to vector<64x8xf32>
    %c2 = arith.constant 2 : index
    %c0_10 = arith.constant 0 : index
    %c0_11 = arith.constant 0 : index
    %17 = vector.load %arg2[%c2, %c0_10, %c0_11] : memref<8x8x128xf32, #tpu.memory_space<vmem>>, vector<1x8x128xf32>
    %18 = vector.shape_cast %17 : vector<1x8x128xf32> to vector<8x128xf32>
    %cst_12 = arith.constant dense<0.000000e+00> : vector<64x128xf32>
    %19 = tpu.matmul %16, %18, %cst_12 {dimension_numbers = #tpu.dot_dimension_numbers<[1], [0], [0], [1], [0, 0, 1, 1], [], []>} : vector<64x8xf32>, vector<8x128xf32>, vector<64x128xf32> -> vector<64x128xf32>
    %20 = arith.addf %14, %19 : vector<64x128xf32>
    %21 = vector.extract_strided_slice %1 {offsets = [9, 0, 0], sizes = [8, 8, 8], strides = [1, 1, 1]} : vector<18x18x8xf32> to vector<8x8x8xf32>
    %22 = vector.shape_cast %21 : vector<8x8x8xf32> to vector<64x8xf32>
    %c3 = arith.constant 3 : index
    %c0_13 = arith.constant 0 : index
    %c0_14 = arith.constant 0 : index
    %23 = vector.load %arg2[%c3, %c0_13, %c0_14] : memref<8x8x128xf32, #tpu.memory_space<vmem>>, vector<1x8x128xf32>
    %24 = vector.shape_cast %23 : vector<1x8x128xf32> to vector<8x128xf32>
    %cst_15 = arith.constant dense<0.000000e+00> : vector<64x128xf32>
    %25 = tpu.matmul %22, %24, %cst_15 {dimension_numbers = #tpu.dot_dimension_numbers<[1], [0], [0], [1], [0, 0, 1, 1], [], []>} : vector<64x8xf32>, vector<8x128xf32>, vector<64x128xf32> -> vector<64x128xf32>
    %26 = arith.addf %20, %25 : vector<64x128xf32>
    %27 = vector.extract_strided_slice %1 {offsets = [9, 1, 0], sizes = [8, 8, 8], strides = [1, 1, 1]} : vector<18x18x8xf32> to vector<8x8x8xf32>
    %28 = vector.shape_cast %27 : vector<8x8x8xf32> to vector<64x8xf32>
    %c4 = arith.constant 4 : index
    %c0_16 = arith.constant 0 : index
    %c0_17 = arith.constant 0 : index
    %29 = vector.load %arg2[%c4, %c0_16, %c0_17] : memref<8x8x128xf32, #tpu.memory_space<vmem>>, vector<1x8x128xf32>
    %30 = vector.shape_cast %29 : vector<1x8x128xf32> to vector<8x128xf32>
    %cst_18 = arith.constant dense<0.000000e+00> : vector<64x128xf32>
    %31 = tpu.matmul %28, %30, %cst_18 {dimension_numbers = #tpu.dot_dimension_numbers<[1], [0], [0], [1], [0, 0, 1, 1], [], []>} : vector<64x8xf32>, vector<8x128xf32>, vector<64x128xf32> -> vector<64x128xf32>
    %32 = arith.addf %26, %31 : vector<64x128xf32>
    %33 = vector.extract_strided_slice %1 {offsets = [1, 0, 0], sizes = [8, 8, 8], strides = [1, 1, 1]} : vector<18x18x8xf32> to vector<8x8x8xf32>
    %34 = vector.shape_cast %33 : vector<8x8x8xf32> to vector<64x8xf32>
    %c5 = arith.constant 5 : index
    %c0_19 = arith.constant 0 : index
    %c0_20 = arith.constant 0 : index
    %35 = vector.load %arg2[%c5, %c0_19, %c0_20] : memref<8x8x128xf32, #tpu.memory_space<vmem>>, vector<1x8x128xf32>
    %36 = vector.shape_cast %35 : vector<1x8x128xf32> to vector<8x128xf32>
    %cst_21 = arith.constant dense<0.000000e+00> : vector<64x128xf32>
    %37 = tpu.matmul %34, %36, %cst_21 {dimension_numbers = #tpu.dot_dimension_numbers<[1], [0], [0], [1], [0, 0, 1, 1], [], []>} : vector<64x8xf32>, vector<8x128xf32>, vector<64x128xf32> -> vector<64x128xf32>
    %38 = arith.addf %32, %37 : vector<64x128xf32>
    %39 = vector.extract_strided_slice %1 {offsets = [1, 9, 0], sizes = [8, 8, 8], strides = [1, 1, 1]} : vector<18x18x8xf32> to vector<8x8x8xf32>
    %40 = vector.shape_cast %39 : vector<8x8x8xf32> to vector<64x8xf32>
    %c6 = arith.constant 6 : index
    %c0_22 = arith.constant 0 : index
    %c0_23 = arith.constant 0 : index
    %41 = vector.load %arg2[%c6, %c0_22, %c0_23] : memref<8x8x128xf32, #tpu.memory_space<vmem>>, vector<1x8x128xf32>
    %42 = vector.shape_cast %41 : vector<1x8x128xf32> to vector<8x128xf32>
    %cst_24 = arith.constant dense<0.000000e+00> : vector<64x128xf32>
    %43 = tpu.matmul %40, %42, %cst_24 {dimension_numbers = #tpu.dot_dimension_numbers<[1], [0], [0], [1], [0, 0, 1, 1], [], []>} : vector<64x8xf32>, vector<8x128xf32>, vector<64x128xf32> -> vector<64x128xf32>
    %44 = arith.addf %38, %43 : vector<64x128xf32>
    %45 = vector.extract_strided_slice %1 {offsets = [1, 1, 0], sizes = [8, 8, 8], strides = [1, 1, 1]} : vector<18x18x8xf32> to vector<8x8x8xf32>
    %46 = vector.shape_cast %45 : vector<8x8x8xf32> to vector<64x8xf32>
    %c7 = arith.constant 7 : index
    %c0_25 = arith.constant 0 : index
    %c0_26 = arith.constant 0 : index
    %47 = vector.load %arg2[%c7, %c0_25, %c0_26] : memref<8x8x128xf32, #tpu.memory_space<vmem>>, vector<1x8x128xf32>
    %48 = vector.shape_cast %47 : vector<1x8x128xf32> to vector<8x128xf32>
    %cst_27 = arith.constant dense<0.000000e+00> : vector<64x128xf32>
    %49 = tpu.matmul %46, %48, %cst_27 {dimension_numbers = #tpu.dot_dimension_numbers<[1], [0], [0], [1], [0, 0, 1, 1], [], []>} : vector<64x8xf32>, vector<8x128xf32>, vector<64x128xf32> -> vector<64x128xf32>
    %50 = arith.addf %44, %49 : vector<64x128xf32>
    %51 = vector.extract_strided_slice %1 {offsets = [9, 9, 0], sizes = [8, 8, 8], strides = [1, 1, 1]} : vector<18x18x8xf32> to vector<8x8x8xf32>
    %52 = vector.shape_cast %51 : vector<8x8x8xf32> to vector<64x8xf32>
    %c0_28 = arith.constant 0 : index
    %c0_29 = arith.constant 0 : index
    %53 = vector.load %arg3[%c0_28, %c0_29] : memref<8x256xf32, #tpu.memory_space<vmem>>, vector<8x256xf32>
    %cst_30 = arith.constant dense<0.000000e+00> : vector<64x256xf32>
    %54 = tpu.matmul %52, %53, %cst_30 {dimension_numbers = #tpu.dot_dimension_numbers<[1], [0], [0], [1], [0, 0, 1, 1], [], []>} : vector<64x8xf32>, vector<8x256xf32>, vector<64x256xf32> -> vector<64x256xf32>
    %55 = vector.extract_strided_slice %54 {offsets = [0, 0], sizes = [64, 128], strides = [1, 1]} : vector<64x256xf32> to vector<64x128xf32>
    %56 = arith.addf %50, %55 : vector<64x128xf32>
    %57 = vector.extract_strided_slice %54 {offsets = [0, 128], sizes = [64, 128], strides = [1, 1]} : vector<64x256xf32> to vector<64x128xf32>
    %c0_31 = arith.constant 0 : index
    %c0_32 = arith.constant 0 : index
    %c0_33 = arith.constant 0 : index
    %58 = vector.load %arg4[%c0_31, %c0_32, %c0_33] : memref<1x64x128xf32, #tpu.memory_space<vmem>>, vector<1x64x128xf32>
    %59 = vector.shape_cast %58 : vector<1x64x128xf32> to vector<64x128xf32>
    %60 = vector.shape_cast %56 : vector<64x128xf32> to vector<1x64x128xf32>
    tpu.vector_store %arg4[%c0_31, %c0_32, %c0_33], %60 {strides = array<i32>} : memref<1x64x128xf32, #tpu.memory_space<vmem>>, vector<1x64x128xf32>,
    %c0_34 = arith.constant 0 : index
    %c0_35 = arith.constant 0 : index
    %c0_36 = arith.constant 0 : index
    %61 = vector.load %arg5[%c0_34, %c0_35, %c0_36] : memref<1x64x128xf32, #tpu.memory_space<vmem>>, vector<1x64x128xf32>
    %62 = vector.shape_cast %61 : vector<1x64x128xf32> to vector<64x128xf32>
    %63 = vector.shape_cast %57 : vector<64x128xf32> to vector<1x64x128xf32>
    tpu.vector_store %arg5[%c0_34, %c0_35, %c0_36], %63 {strides = array<i32>} : memref<1x64x128xf32, #tpu.memory_space<vmem>>, vector<1x64x128xf32>,
    %cst_37 = arith.constant dense<0.000000e+00> : vector<128xf32>
    %64 = vector.multi_reduction <add>, %56, %cst_37 [0] : vector<64x128xf32> to vector<128xf32>
    %65 = vector.shape_cast %64 : vector<128xf32> to vector<1x128xf32>
    %66 = arith.mulf %56, %56 : vector<64x128xf32>
    %cst_38 = arith.constant dense<0.000000e+00> : vector<128xf32>
    %67 = vector.multi_reduction <add>, %66, %cst_38 [0] : vector<64x128xf32> to vector<128xf32>
    %68 = vector.shape_cast %67 : vector<128xf32> to vector<1x128xf32>
    %cst_39 = arith.constant dense<0.000000e+00> : vector<128xf32>
    %69 = vector.multi_reduction <add>, %57, %cst_39 [0] : vector<64x128xf32> to vector<128xf32>
    %70 = vector.shape_cast %69 : vector<128xf32> to vector<1x128xf32>
    %71 = arith.mulf %57, %57 : vector<64x128xf32>
    %cst_40 = arith.constant dense<0.000000e+00> : vector<128xf32>
    %72 = vector.multi_reduction <add>, %71, %cst_40 [0] : vector<64x128xf32> to vector<128xf32>
    %73 = vector.shape_cast %72 : vector<128xf32> to vector<1x128xf32>
    %cst_41 = arith.constant 0.000000e+00 : f32
    %74 = vector.broadcast %cst_41 : f32 to vector<4x128xf32>
    %75 = tpu.concatenate %65, %68, %70, %73, %74 in 0 : vector<1x128xf32>, vector<1x128xf32>, vector<1x128xf32>, vector<1x128xf32>, vector<4x128xf32> -> vector<8x128xf32>
    %c0_42 = arith.constant 0 : index
    %c0_43 = arith.constant 0 : index
    %c0_44 = arith.constant 0 : index
    %76 = vector.load %arg6[%c0_42, %c0_43, %c0_44] : memref<1x8x128xf32, #tpu.memory_space<vmem>>, vector<1x8x128xf32>
    %77 = vector.shape_cast %76 : vector<1x8x128xf32> to vector<8x128xf32>
    %78 = vector.shape_cast %75 : vector<8x128xf32> to vector<1x8x128xf32>
    tpu.vector_store %arg6[%c0_42, %c0_43, %c0_44], %78 {strides = array<i32>} : memref<1x8x128xf32, #tpu.memory_space<vmem>>, vector<1x8x128xf32>,
    return
  }
  func.func @transform_0(%arg0: i32) -> (i32, i32, i32, i32) {
    %c0_i32 = arith.constant 0 : i32
    %c0_i32_0 = arith.constant 0 : i32
    %c0_i32_1 = arith.constant 0 : i32
    %c0_i32_2 = arith.constant 0 : i32
    return %arg0, %c0_i32, %c0_i32_0, %c0_i32_1 : i32, i32, i32, i32
  }
  func.func @transform_1(%arg0: i32) -> (i32, i32, i32) {
    %c0_i32 = arith.constant 0 : i32
    %c0_i32_0 = arith.constant 0 : i32
    %c0_i32_1 = arith.constant 0 : i32
    %c0_i32_2 = arith.constant 0 : i32
    return %c0_i32, %c0_i32_0, %c0_i32_1 : i32, i32, i32
  }
  func.func @transform_2(%arg0: i32) -> (i32, i32) {
    %c0_i32 = arith.constant 0 : i32
    %c0_i32_0 = arith.constant 0 : i32
    %c0_i32_1 = arith.constant 0 : i32
    return %c0_i32, %c0_i32_0 : i32, i32
  }
  func.func @transform_3(%arg0: i32) -> (i32, i32, i32) {
    %c0_i32 = arith.constant 0 : i32
    %c0_i32_0 = arith.constant 0 : i32
    %c0_i32_1 = arith.constant 0 : i32
    return %arg0, %c0_i32, %c0_i32_0 : i32, i32, i32
  }
  func.func @transform_4(%arg0: i32) -> (i32, i32, i32) {
    %c0_i32 = arith.constant 0 : i32
    %c0_i32_0 = arith.constant 0 : i32
    %c0_i32_1 = arith.constant 0 : i32
    return %arg0, %c0_i32, %c0_i32_0 : i32, i32, i32
  }
  func.func @transform_5(%arg0: i32) -> (i32, i32, i32) {
    %c0_i32 = arith.constant 0 : i32
    %c0_i32_0 = arith.constant 0 : i32
    %c0_i32_1 = arith.constant 0 : i32
    return %arg0, %c0_i32, %c0_i32_0 : i32, i32, i32
  }
}

module attributes {stable_mosaic.version = 11 : i64} {
  func.func @_conv2_kernel(%arg0: i32, %arg1: memref<1x10x10x128xf32, #tpu.memory_space<vmem>>, %arg2: memref<9x128x128xf32, #tpu.memory_space<vmem>>, %arg3: memref<1x1x128xf32, #tpu.memory_space<vmem>>, %arg4: memref<1x1x128xf32, #tpu.memory_space<vmem>>, %arg5: memref<1x64x128xf32, #tpu.memory_space<vmem>>, %arg6: memref<1x8x128xf32, #tpu.memory_space<vmem>>) attributes {dimension_semantics = [#tpu.dimension_semantics<parallel>], iteration_bounds = array<i64: 2>, scalar_prefetch = 0 : i64, scratch_operands = 0 : i64, tpu.core_type = #tpu.core_type<tc>, window_params = [{transform_indices = @transform_0, window_bounds = array<i64: 1, 10, 10, 128>}, {pipeline_mode = #tpu.pipeline_mode<synchronous>, transform_indices = @transform_1, window_bounds = array<i64: 9, 128, 128>}, {pipeline_mode = #tpu.pipeline_mode<synchronous>, transform_indices = @transform_2, window_bounds = array<i64: 1, 1, 128>}, {pipeline_mode = #tpu.pipeline_mode<synchronous>, transform_indices = @transform_3, window_bounds = array<i64: 1, 1, 128>}, {transform_indices = @transform_4, window_bounds = array<i64: 1, 64, 128>}, {transform_indices = @transform_5, window_bounds = array<i64: 1, 8, 128>}]} {
    %c0 = arith.constant 0 : index
    %c0_0 = arith.constant 0 : index
    %c0_1 = arith.constant 0 : index
    %c0_2 = arith.constant 0 : index
    %0 = vector.load %arg1[%c0, %c0_0, %c0_1, %c0_2] : memref<1x10x10x128xf32, #tpu.memory_space<vmem>>, vector<1x10x10x128xf32>
    %1 = vector.shape_cast %0 : vector<1x10x10x128xf32> to vector<10x10x128xf32>
    %2 = tpu.iota {dimensions = array<i32: 0>} : vector<10x10x1xi32>
    %3 = tpu.iota {dimensions = array<i32: 1>} : vector<10x10x1xi32>
    %c1_i32 = arith.constant 1 : i32
    %4 = vector.broadcast %c1_i32 : i32 to vector<10x10x1xi32>
    %5 = arith.cmpi sge, %2, %4 : vector<10x10x1xi32>
    %c8_i32 = arith.constant 8 : i32
    %6 = vector.broadcast %c8_i32 : i32 to vector<10x10x1xi32>
    %7 = arith.cmpi sle, %2, %6 : vector<10x10x1xi32>
    %8 = arith.andi %5, %7 : vector<10x10x1xi1>
    %c1_i32_3 = arith.constant 1 : i32
    %9 = vector.broadcast %c1_i32_3 : i32 to vector<10x10x1xi32>
    %10 = arith.cmpi sge, %3, %9 : vector<10x10x1xi32>
    %11 = arith.andi %8, %10 : vector<10x10x1xi1>
    %c8_i32_4 = arith.constant 8 : i32
    %12 = vector.broadcast %c8_i32_4 : i32 to vector<10x10x1xi32>
    %13 = arith.cmpi sle, %3, %12 : vector<10x10x1xi32>
    %14 = arith.andi %11, %13 : vector<10x10x1xi1>
    %c0_5 = arith.constant 0 : index
    %c0_6 = arith.constant 0 : index
    %c0_7 = arith.constant 0 : index
    %15 = vector.load %arg3[%c0_5, %c0_6, %c0_7] : memref<1x1x128xf32, #tpu.memory_space<vmem>>, vector<1x1x128xf32>
    %16 = vector.broadcast %15 : vector<1x1x128xf32> to vector<10x10x128xf32>
    %17 = arith.mulf %1, %16 : vector<10x10x128xf32>
    %c0_8 = arith.constant 0 : index
    %c0_9 = arith.constant 0 : index
    %c0_10 = arith.constant 0 : index
    %18 = vector.load %arg4[%c0_8, %c0_9, %c0_10] : memref<1x1x128xf32, #tpu.memory_space<vmem>>, vector<1x1x128xf32>
    %19 = vector.broadcast %18 : vector<1x1x128xf32> to vector<10x10x128xf32>
    %20 = arith.addf %17, %19 : vector<10x10x128xf32>
    %cst = arith.constant 0.000000e+00 : f32
    %21 = vector.broadcast %cst : f32 to vector<10x10x128xf32>
    %22 = arith.maximumf %20, %21 : vector<10x10x128xf32>
    %cst_11 = arith.constant 0.000000e+00 : f32
    %23 = vector.shape_cast %14 : vector<10x10x1xi1> to vector<10x10x1xi1>
    %24 = vector.broadcast %23 : vector<10x10x1xi1> to vector<10x10x128xi1>
    %25 = vector.broadcast %cst_11 : f32 to vector<10x10x128xf32>
    %26 = arith.select %24, %22, %25 : vector<10x10x128xi1>, vector<10x10x128xf32>
    %cst_12 = arith.constant 0.000000e+00 : f32
    %27 = vector.broadcast %cst_12 : f32 to vector<64x128xf32>
    %28 = vector.extract_strided_slice %26 {offsets = [0, 0, 0], sizes = [8, 8, 128], strides = [1, 1, 1]} : vector<10x10x128xf32> to vector<8x8x128xf32>
    %29 = vector.shape_cast %28 : vector<8x8x128xf32> to vector<64x128xf32>
    %c0_13 = arith.constant 0 : index
    %c0_14 = arith.constant 0 : index
    %c0_15 = arith.constant 0 : index
    %30 = vector.load %arg2[%c0_13, %c0_14, %c0_15] : memref<9x128x128xf32, #tpu.memory_space<vmem>>, vector<1x128x128xf32>
    %31 = vector.shape_cast %30 : vector<1x128x128xf32> to vector<128x128xf32>
    %cst_16 = arith.constant dense<0.000000e+00> : vector<64x128xf32>
    %32 = tpu.matmul %29, %31, %cst_16 {dimension_numbers = #tpu.dot_dimension_numbers<[1], [0], [0], [1], [0, 0, 1, 1], [], []>} : vector<64x128xf32>, vector<128x128xf32>, vector<64x128xf32> -> vector<64x128xf32>
    %33 = arith.addf %27, %32 : vector<64x128xf32>
    %34 = vector.extract_strided_slice %26 {offsets = [0, 1, 0], sizes = [8, 8, 128], strides = [1, 1, 1]} : vector<10x10x128xf32> to vector<8x8x128xf32>
    %35 = vector.shape_cast %34 : vector<8x8x128xf32> to vector<64x128xf32>
    %c1 = arith.constant 1 : index
    %c0_17 = arith.constant 0 : index
    %c0_18 = arith.constant 0 : index
    %36 = vector.load %arg2[%c1, %c0_17, %c0_18] : memref<9x128x128xf32, #tpu.memory_space<vmem>>, vector<1x128x128xf32>
    %37 = vector.shape_cast %36 : vector<1x128x128xf32> to vector<128x128xf32>
    %cst_19 = arith.constant dense<0.000000e+00> : vector<64x128xf32>
    %38 = tpu.matmul %35, %37, %cst_19 {dimension_numbers = #tpu.dot_dimension_numbers<[1], [0], [0], [1], [0, 0, 1, 1], [], []>} : vector<64x128xf32>, vector<128x128xf32>, vector<64x128xf32> -> vector<64x128xf32>
    %39 = arith.addf %33, %38 : vector<64x128xf32>
    %40 = vector.extract_strided_slice %26 {offsets = [0, 2, 0], sizes = [8, 8, 128], strides = [1, 1, 1]} : vector<10x10x128xf32> to vector<8x8x128xf32>
    %41 = vector.shape_cast %40 : vector<8x8x128xf32> to vector<64x128xf32>
    %c2 = arith.constant 2 : index
    %c0_20 = arith.constant 0 : index
    %c0_21 = arith.constant 0 : index
    %42 = vector.load %arg2[%c2, %c0_20, %c0_21] : memref<9x128x128xf32, #tpu.memory_space<vmem>>, vector<1x128x128xf32>
    %43 = vector.shape_cast %42 : vector<1x128x128xf32> to vector<128x128xf32>
    %cst_22 = arith.constant dense<0.000000e+00> : vector<64x128xf32>
    %44 = tpu.matmul %41, %43, %cst_22 {dimension_numbers = #tpu.dot_dimension_numbers<[1], [0], [0], [1], [0, 0, 1, 1], [], []>} : vector<64x128xf32>, vector<128x128xf32>, vector<64x128xf32> -> vector<64x128xf32>
    %45 = arith.addf %39, %44 : vector<64x128xf32>
    %46 = vector.extract_strided_slice %26 {offsets = [1, 0, 0], sizes = [8, 8, 128], strides = [1, 1, 1]} : vector<10x10x128xf32> to vector<8x8x128xf32>
    %47 = vector.shape_cast %46 : vector<8x8x128xf32> to vector<64x128xf32>
    %c3 = arith.constant 3 : index
    %c0_23 = arith.constant 0 : index
    %c0_24 = arith.constant 0 : index
    %48 = vector.load %arg2[%c3, %c0_23, %c0_24] : memref<9x128x128xf32, #tpu.memory_space<vmem>>, vector<1x128x128xf32>
    %49 = vector.shape_cast %48 : vector<1x128x128xf32> to vector<128x128xf32>
    %cst_25 = arith.constant dense<0.000000e+00> : vector<64x128xf32>
    %50 = tpu.matmul %47, %49, %cst_25 {dimension_numbers = #tpu.dot_dimension_numbers<[1], [0], [0], [1], [0, 0, 1, 1], [], []>} : vector<64x128xf32>, vector<128x128xf32>, vector<64x128xf32> -> vector<64x128xf32>
    %51 = arith.addf %45, %50 : vector<64x128xf32>
    %52 = vector.extract_strided_slice %26 {offsets = [1, 1, 0], sizes = [8, 8, 128], strides = [1, 1, 1]} : vector<10x10x128xf32> to vector<8x8x128xf32>
    %53 = vector.shape_cast %52 : vector<8x8x128xf32> to vector<64x128xf32>
    %c4 = arith.constant 4 : index
    %c0_26 = arith.constant 0 : index
    %c0_27 = arith.constant 0 : index
    %54 = vector.load %arg2[%c4, %c0_26, %c0_27] : memref<9x128x128xf32, #tpu.memory_space<vmem>>, vector<1x128x128xf32>
    %55 = vector.shape_cast %54 : vector<1x128x128xf32> to vector<128x128xf32>
    %cst_28 = arith.constant dense<0.000000e+00> : vector<64x128xf32>
    %56 = tpu.matmul %53, %55, %cst_28 {dimension_numbers = #tpu.dot_dimension_numbers<[1], [0], [0], [1], [0, 0, 1, 1], [], []>} : vector<64x128xf32>, vector<128x128xf32>, vector<64x128xf32> -> vector<64x128xf32>
    %57 = arith.addf %51, %56 : vector<64x128xf32>
    %58 = vector.extract_strided_slice %26 {offsets = [1, 2, 0], sizes = [8, 8, 128], strides = [1, 1, 1]} : vector<10x10x128xf32> to vector<8x8x128xf32>
    %59 = vector.shape_cast %58 : vector<8x8x128xf32> to vector<64x128xf32>
    %c5 = arith.constant 5 : index
    %c0_29 = arith.constant 0 : index
    %c0_30 = arith.constant 0 : index
    %60 = vector.load %arg2[%c5, %c0_29, %c0_30] : memref<9x128x128xf32, #tpu.memory_space<vmem>>, vector<1x128x128xf32>
    %61 = vector.shape_cast %60 : vector<1x128x128xf32> to vector<128x128xf32>
    %cst_31 = arith.constant dense<0.000000e+00> : vector<64x128xf32>
    %62 = tpu.matmul %59, %61, %cst_31 {dimension_numbers = #tpu.dot_dimension_numbers<[1], [0], [0], [1], [0, 0, 1, 1], [], []>} : vector<64x128xf32>, vector<128x128xf32>, vector<64x128xf32> -> vector<64x128xf32>
    %63 = arith.addf %57, %62 : vector<64x128xf32>
    %64 = vector.extract_strided_slice %26 {offsets = [2, 0, 0], sizes = [8, 8, 128], strides = [1, 1, 1]} : vector<10x10x128xf32> to vector<8x8x128xf32>
    %65 = vector.shape_cast %64 : vector<8x8x128xf32> to vector<64x128xf32>
    %c6 = arith.constant 6 : index
    %c0_32 = arith.constant 0 : index
    %c0_33 = arith.constant 0 : index
    %66 = vector.load %arg2[%c6, %c0_32, %c0_33] : memref<9x128x128xf32, #tpu.memory_space<vmem>>, vector<1x128x128xf32>
    %67 = vector.shape_cast %66 : vector<1x128x128xf32> to vector<128x128xf32>
    %cst_34 = arith.constant dense<0.000000e+00> : vector<64x128xf32>
    %68 = tpu.matmul %65, %67, %cst_34 {dimension_numbers = #tpu.dot_dimension_numbers<[1], [0], [0], [1], [0, 0, 1, 1], [], []>} : vector<64x128xf32>, vector<128x128xf32>, vector<64x128xf32> -> vector<64x128xf32>
    %69 = arith.addf %63, %68 : vector<64x128xf32>
    %70 = vector.extract_strided_slice %26 {offsets = [2, 1, 0], sizes = [8, 8, 128], strides = [1, 1, 1]} : vector<10x10x128xf32> to vector<8x8x128xf32>
    %71 = vector.shape_cast %70 : vector<8x8x128xf32> to vector<64x128xf32>
    %c7 = arith.constant 7 : index
    %c0_35 = arith.constant 0 : index
    %c0_36 = arith.constant 0 : index
    %72 = vector.load %arg2[%c7, %c0_35, %c0_36] : memref<9x128x128xf32, #tpu.memory_space<vmem>>, vector<1x128x128xf32>
    %73 = vector.shape_cast %72 : vector<1x128x128xf32> to vector<128x128xf32>
    %cst_37 = arith.constant dense<0.000000e+00> : vector<64x128xf32>
    %74 = tpu.matmul %71, %73, %cst_37 {dimension_numbers = #tpu.dot_dimension_numbers<[1], [0], [0], [1], [0, 0, 1, 1], [], []>} : vector<64x128xf32>, vector<128x128xf32>, vector<64x128xf32> -> vector<64x128xf32>
    %75 = arith.addf %69, %74 : vector<64x128xf32>
    %76 = vector.extract_strided_slice %26 {offsets = [2, 2, 0], sizes = [8, 8, 128], strides = [1, 1, 1]} : vector<10x10x128xf32> to vector<8x8x128xf32>
    %77 = vector.shape_cast %76 : vector<8x8x128xf32> to vector<64x128xf32>
    %c8 = arith.constant 8 : index
    %c0_38 = arith.constant 0 : index
    %c0_39 = arith.constant 0 : index
    %78 = vector.load %arg2[%c8, %c0_38, %c0_39] : memref<9x128x128xf32, #tpu.memory_space<vmem>>, vector<1x128x128xf32>
    %79 = vector.shape_cast %78 : vector<1x128x128xf32> to vector<128x128xf32>
    %cst_40 = arith.constant dense<0.000000e+00> : vector<64x128xf32>
    %80 = tpu.matmul %77, %79, %cst_40 {dimension_numbers = #tpu.dot_dimension_numbers<[1], [0], [0], [1], [0, 0, 1, 1], [], []>} : vector<64x128xf32>, vector<128x128xf32>, vector<64x128xf32> -> vector<64x128xf32>
    %81 = arith.addf %75, %80 : vector<64x128xf32>
    %c0_41 = arith.constant 0 : index
    %c0_42 = arith.constant 0 : index
    %c0_43 = arith.constant 0 : index
    %82 = vector.load %arg5[%c0_41, %c0_42, %c0_43] : memref<1x64x128xf32, #tpu.memory_space<vmem>>, vector<1x64x128xf32>
    %83 = vector.shape_cast %82 : vector<1x64x128xf32> to vector<64x128xf32>
    %84 = vector.shape_cast %81 : vector<64x128xf32> to vector<1x64x128xf32>
    tpu.vector_store %arg5[%c0_41, %c0_42, %c0_43], %84 {strides = array<i32>} : memref<1x64x128xf32, #tpu.memory_space<vmem>>, vector<1x64x128xf32>,
    %cst_44 = arith.constant dense<0.000000e+00> : vector<128xf32>
    %85 = vector.multi_reduction <add>, %81, %cst_44 [0] : vector<64x128xf32> to vector<128xf32>
    %86 = vector.shape_cast %85 : vector<128xf32> to vector<1x128xf32>
    %87 = arith.mulf %81, %81 : vector<64x128xf32>
    %cst_45 = arith.constant dense<0.000000e+00> : vector<128xf32>
    %88 = vector.multi_reduction <add>, %87, %cst_45 [0] : vector<64x128xf32> to vector<128xf32>
    %89 = vector.shape_cast %88 : vector<128xf32> to vector<1x128xf32>
    %cst_46 = arith.constant 0.000000e+00 : f32
    %90 = vector.broadcast %cst_46 : f32 to vector<6x128xf32>
    %91 = tpu.concatenate %86, %89, %90 in 0 : vector<1x128xf32>, vector<1x128xf32>, vector<6x128xf32> -> vector<8x128xf32>
    %c0_47 = arith.constant 0 : index
    %c0_48 = arith.constant 0 : index
    %c0_49 = arith.constant 0 : index
    %92 = vector.load %arg6[%c0_47, %c0_48, %c0_49] : memref<1x8x128xf32, #tpu.memory_space<vmem>>, vector<1x8x128xf32>
    %93 = vector.shape_cast %92 : vector<1x8x128xf32> to vector<8x128xf32>
    %94 = vector.shape_cast %91 : vector<8x128xf32> to vector<1x8x128xf32>
    tpu.vector_store %arg6[%c0_47, %c0_48, %c0_49], %94 {strides = array<i32>} : memref<1x8x128xf32, #tpu.memory_space<vmem>>, vector<1x8x128xf32>,
    return
  }
  func.func @transform_0(%arg0: i32) -> (i32, i32, i32, i32) {
    %c0_i32 = arith.constant 0 : i32
    %c0_i32_0 = arith.constant 0 : i32
    %c0_i32_1 = arith.constant 0 : i32
    %c0_i32_2 = arith.constant 0 : i32
    return %arg0, %c0_i32, %c0_i32_0, %c0_i32_1 : i32, i32, i32, i32
  }
  func.func @transform_1(%arg0: i32) -> (i32, i32, i32) {
    %c0_i32 = arith.constant 0 : i32
    %c0_i32_0 = arith.constant 0 : i32
    %c0_i32_1 = arith.constant 0 : i32
    %c0_i32_2 = arith.constant 0 : i32
    return %c0_i32, %c0_i32_0, %c0_i32_1 : i32, i32, i32
  }
  func.func @transform_2(%arg0: i32) -> (i32, i32, i32) {
    %c0_i32 = arith.constant 0 : i32
    %c0_i32_0 = arith.constant 0 : i32
    %c0_i32_1 = arith.constant 0 : i32
    %c0_i32_2 = arith.constant 0 : i32
    return %c0_i32, %c0_i32_0, %c0_i32_1 : i32, i32, i32
  }
  func.func @transform_3(%arg0: i32) -> (i32, i32, i32) {
    %c0_i32 = arith.constant 0 : i32
    %c0_i32_0 = arith.constant 0 : i32
    %c0_i32_1 = arith.constant 0 : i32
    %c0_i32_2 = arith.constant 0 : i32
    return %c0_i32, %c0_i32_0, %c0_i32_1 : i32, i32, i32
  }
  func.func @transform_4(%arg0: i32) -> (i32, i32, i32) {
    %c0_i32 = arith.constant 0 : i32
    %c0_i32_0 = arith.constant 0 : i32
    %c0_i32_1 = arith.constant 0 : i32
    return %arg0, %c0_i32, %c0_i32_0 : i32, i32, i32
  }
  func.func @transform_5(%arg0: i32) -> (i32, i32, i32) {
    %c0_i32 = arith.constant 0 : i32
    %c0_i32_0 = arith.constant 0 : i32
    %c0_i32_1 = arith.constant 0 : i32
    return %arg0, %c0_i32, %c0_i32_0 : i32, i32, i32
  }
}

module attributes {stable_mosaic.version = 11 : i64} {
  func.func @_dual_bn_add_relu_kernel(%arg0: i32, %arg1: memref<128x128xf32, #tpu.memory_space<vmem>>, %arg2: memref<128x128xf32, #tpu.memory_space<vmem>>, %arg3: memref<1x128xf32, #tpu.memory_space<vmem>>, %arg4: memref<1x128xf32, #tpu.memory_space<vmem>>, %arg5: memref<1x128xf32, #tpu.memory_space<vmem>>, %arg6: memref<1x128xf32, #tpu.memory_space<vmem>>, %arg7: memref<128x128xf32, #tpu.memory_space<vmem>>) attributes {dimension_semantics = [#tpu.dimension_semantics<parallel>], iteration_bounds = array<i64: 1>, scalar_prefetch = 0 : i64, scratch_operands = 0 : i64, tpu.core_type = #tpu.core_type<tc>, window_params = [{transform_indices = @transform_0, window_bounds = array<i64: 128, 128>}, {transform_indices = @transform_1, window_bounds = array<i64: 128, 128>}, {pipeline_mode = #tpu.pipeline_mode<synchronous>, transform_indices = @transform_2, window_bounds = array<i64: 1, 128>}, {pipeline_mode = #tpu.pipeline_mode<synchronous>, transform_indices = @transform_3, window_bounds = array<i64: 1, 128>}, {pipeline_mode = #tpu.pipeline_mode<synchronous>, transform_indices = @transform_4, window_bounds = array<i64: 1, 128>}, {pipeline_mode = #tpu.pipeline_mode<synchronous>, transform_indices = @transform_5, window_bounds = array<i64: 1, 128>}, {transform_indices = @transform_6, window_bounds = array<i64: 128, 128>}]} {
    %c0 = arith.constant 0 : index
    %c0_0 = arith.constant 0 : index
    %0 = vector.load %arg1[%c0, %c0_0] : memref<128x128xf32, #tpu.memory_space<vmem>>, vector<128x128xf32>
    %c0_1 = arith.constant 0 : index
    %c0_2 = arith.constant 0 : index
    %1 = vector.load %arg3[%c0_1, %c0_2] : memref<1x128xf32, #tpu.memory_space<vmem>>, vector<1x128xf32>
    %2 = vector.broadcast %1 : vector<1x128xf32> to vector<128x128xf32>
    %3 = arith.mulf %0, %2 : vector<128x128xf32>
    %c0_3 = arith.constant 0 : index
    %c0_4 = arith.constant 0 : index
    %4 = vector.load %arg4[%c0_3, %c0_4] : memref<1x128xf32, #tpu.memory_space<vmem>>, vector<1x128xf32>
    %5 = vector.broadcast %4 : vector<1x128xf32> to vector<128x128xf32>
    %6 = arith.addf %3, %5 : vector<128x128xf32>
    %c0_5 = arith.constant 0 : index
    %c0_6 = arith.constant 0 : index
    %7 = vector.load %arg2[%c0_5, %c0_6] : memref<128x128xf32, #tpu.memory_space<vmem>>, vector<128x128xf32>
    %c0_7 = arith.constant 0 : index
    %c0_8 = arith.constant 0 : index
    %8 = vector.load %arg5[%c0_7, %c0_8] : memref<1x128xf32, #tpu.memory_space<vmem>>, vector<1x128xf32>
    %9 = vector.broadcast %8 : vector<1x128xf32> to vector<128x128xf32>
    %10 = arith.mulf %7, %9 : vector<128x128xf32>
    %c0_9 = arith.constant 0 : index
    %c0_10 = arith.constant 0 : index
    %11 = vector.load %arg6[%c0_9, %c0_10] : memref<1x128xf32, #tpu.memory_space<vmem>>, vector<1x128xf32>
    %12 = vector.broadcast %11 : vector<1x128xf32> to vector<128x128xf32>
    %13 = arith.addf %10, %12 : vector<128x128xf32>
    %14 = arith.addf %6, %13 : vector<128x128xf32>
    %cst = arith.constant 0.000000e+00 : f32
    %15 = vector.broadcast %cst : f32 to vector<128x128xf32>
    %16 = arith.maximumf %14, %15 : vector<128x128xf32>
    %c0_11 = arith.constant 0 : index
    %c0_12 = arith.constant 0 : index
    %17 = vector.load %arg7[%c0_11, %c0_12] : memref<128x128xf32, #tpu.memory_space<vmem>>, vector<128x128xf32>
    tpu.vector_store %arg7[%c0_11, %c0_12], %16 {strides = array<i32>} : memref<128x128xf32, #tpu.memory_space<vmem>>, vector<128x128xf32>,
    return
  }
  func.func @transform_0(%arg0: i32) -> (i32, i32) {
    %c0_i32 = arith.constant 0 : i32
    %c0_i32_0 = arith.constant 0 : i32
    return %arg0, %c0_i32 : i32, i32
  }
  func.func @transform_1(%arg0: i32) -> (i32, i32) {
    %c0_i32 = arith.constant 0 : i32
    %c0_i32_0 = arith.constant 0 : i32
    return %arg0, %c0_i32 : i32, i32
  }
  func.func @transform_2(%arg0: i32) -> (i32, i32) {
    %c0_i32 = arith.constant 0 : i32
    %c0_i32_0 = arith.constant 0 : i32
    %c0_i32_1 = arith.constant 0 : i32
    return %c0_i32, %c0_i32_0 : i32, i32
  }
  func.func @transform_3(%arg0: i32) -> (i32, i32) {
    %c0_i32 = arith.constant 0 : i32
    %c0_i32_0 = arith.constant 0 : i32
    %c0_i32_1 = arith.constant 0 : i32
    return %c0_i32, %c0_i32_0 : i32, i32
  }
  func.func @transform_4(%arg0: i32) -> (i32, i32) {
    %c0_i32 = arith.constant 0 : i32
    %c0_i32_0 = arith.constant 0 : i32
    %c0_i32_1 = arith.constant 0 : i32
    return %c0_i32, %c0_i32_0 : i32, i32
  }
  func.func @transform_5(%arg0: i32) -> (i32, i32) {
    %c0_i32 = arith.constant 0 : i32
    %c0_i32_0 = arith.constant 0 : i32
    %c0_i32_1 = arith.constant 0 : i32
    return %c0_i32, %c0_i32_0 : i32, i32
  }
  func.func @transform_6(%arg0: i32) -> (i32, i32) {
    %c0_i32 = arith.constant 0 : i32
    %c0_i32_0 = arith.constant 0 : i32
    return %arg0, %c0_i32 : i32, i32
  }
}

</mosaic_0001>

<bundles_post_ra>
// kernel: restnet_down_block.5
= control target key start
LH: loop header
LB: loop body
LE: loop exit
PB: predicated region body
PF: predicated region fallthrough
CT: control target
= control target key end

     0   :  { %s466_s0 = inlined_call_operand.vmem [shape: f32[128,128], index: 0, kind: input, shape index: {}]   ;;  %s467_s1 = inlined_call_operand.vmem [shape: f32[128,128], index: 1, kind: input, shape index: {}]   ;;  %s468_s2 = inlined_call_operand.vmem [shape: f32[1,128], index: 2, kind: input, shape index: {}]   ;;  %s469_s3 = inlined_call_operand.vmem [shape: f32[1,128], index: 3, kind: input, shape index: {}]   ;;  %s470_s4 = inlined_call_operand.vmem [shape: f32[1,128], index: 4, kind: input, shape index: {}]   ;;  %s471_s5 = inlined_call_operand.vmem [shape: f32[1,128], index: 5, kind: input, shape index: {}]   ;;  %s472_s6 = inlined_call_operand.vmem [shape: f32[128,128], index: 6, kind: output, shape index: {}]  }
   0x1   :  { %v23_v0 = vld [vmem:[%s466_s0] sm:$0xff]  ;;  %v24_v8 = vld [vmem:[%s466_s0 + $0x8] sm:$0xff]  ;;  %v25_v10 = vld [vmem:[%s466_s0 + $0x10] sm:$0xff] }
   0x2   :  { %v244_v1 = vld [vmem:[%s468_s2] ss:$0 sm:$0xff]  ;;  %v86_v9 = vld [vmem:[%s467_s1 + $0x8] sm:$0xff]  ;;  %v87_v15 = vld [vmem:[%s467_s1 + $0x10] sm:$0xff] }
   0x3   :  { %v249_v2 = vld [vmem:[%s469_s3] ss:$0 sm:$0xff]  ;;  %v46_v3 = vmul.f32 %v244_v1, %v23_v0  ;;  %v47_v12 = vmul.f32 %v244_v1, %v24_v8  ;;  %v48_v14 = vmul.f32 %v244_v1, %v25_v10  ;;  %v26_v16 = vld [vmem:[%s466_s0 + $0x18] sm:$0xff]  ;;  %v28_v24 = vld [vmem:[%s466_s0 + $0x28] sm:$0xff] }
   0x4   :  { %v85_v4 = vld [vmem:[%s467_s1] sm:$0xff]  ;;  %v88_v17 = vld [vmem:[%s467_s1 + $0x18] sm:$0xff]  ;;  %v49_v20 = vmul.f32 %v244_v1, %v26_v16  ;;  %v90_v29 = vld [vmem:[%s467_s1 + $0x28] sm:$0xff]  ;;  %v51_v38 = vmul.f32 %v244_v1, %v28_v24 }
   0x5   :  { %v258_v5 = vld [vmem:[%s470_s4] ss:$0 sm:$0xff]  ;;  %v69_v11 = vadd.f32 %v249_v2, %v46_v3  ;;  %v70_v25 = vadd.f32 %v249_v2, %v47_v12  ;;  %v71_v27 = vadd.f32 %v249_v2, %v48_v14  ;;  %v29_v34 = vld [vmem:[%s466_s0 + $0x30] sm:$0xff]  ;;  %v30_v44 = vld [vmem:[%s466_s0 + $0x38] sm:$0xff] }
   0x6   :  { %v263_v6 = vld [vmem:[%s471_s5] ss:$0 sm:$0xff]  ;;  %v108_v7 = vmul.f32 %v258_v5, %v85_v4  ;;  %v109_v13 = vmul.f32 %v258_v5, %v86_v9  ;;  %v110_v19 = vmul.f32 %v258_v5, %v87_v15  ;;  %v111_v21 = vmul.f32 %v258_v5, %v88_v17  ;;  %v91_v39 = vld [vmem:[%s467_s1 + $0x30] sm:$0xff]  ;;  %v92_v45 = vld [vmem:[%s467_s1 + $0x38] sm:$0xff] }
   0x7   :  { %v27_v22 = vld [vmem:[%s466_s0 + $0x20] sm:$0xff]  ;;  %v72_v32 = vadd.f32 %v249_v2, %v49_v20  ;;  %v113_v43 = vmul.f32 %v258_v5, %v90_v29  ;;  %v74_v48 = vadd.f32 %v249_v2, %v51_v38  ;;  %v52_v49 = vmul.f32 %v244_v1, %v29_v34  ;;  %v32_v56 = vld [vmem:[%s466_s0 + $0x48] sm:$0xff]  ;;  %v33_v4 = vld [vmem:[%s466_s0 + $0x50] sm:$0xff] }
   0x8   :  { %v131_v18 = vadd.f32 %v263_v6, %v108_v7  ;;  %v89_v23 = vld [vmem:[%s467_s1 + $0x20] sm:$0xff]  ;;  %v132_v26 = vadd.f32 %v263_v6, %v109_v13  ;;  %v50_v28 = vmul.f32 %v244_v1, %v27_v22  ;;  %v133_v31 = vadd.f32 %v263_v6, %v110_v19  ;;  %v94_v3 = vld [vmem:[%s467_s1 + $0x48] sm:$0xff]  ;;  %v34_v12 = vld [vmem:[%s466_s0 + $0x58] sm:$0xff] }
   0x9   :  { %v134_v33 = vadd.f32 %v263_v6, %v111_v21  ;;  %v112_v37 = vmul.f32 %v258_v5, %v89_v23  ;;  %v31_v50 = vld [vmem:[%s466_s0 + $0x40] sm:$0xff]  ;;  %v136_v54 = vadd.f32 %v263_v6, %v113_v43  ;;  %v114_v55 = vmul.f32 %v258_v5, %v91_v39  ;;  %v96_v17 = vld [vmem:[%s467_s1 + $0x58] sm:$0xff]  ;;  %v37_v34 = vld [vmem:[%s466_s0 + $0x70] sm:$0xff] }
   0xa   :  { %v147_v30 = vadd.f32 %v131_v18, %v69_v11  ;;  %v148_v35 = vadd.f32 %v132_v26, %v70_v25  ;;  %v73_v36 = vadd.f32 %v249_v2, %v50_v28  ;;  %v149_v41 = vadd.f32 %v133_v31, %v71_v27  ;;  %v93_v51 = vld [vmem:[%s467_s1 + $0x40] sm:$0xff]  ;;  %v95_v11 = vld [vmem:[%s467_s1 + $0x50] sm:$0xff]  ;;  %v36_v28 = vld [vmem:[%s466_s0 + $0x68] sm:$0xff] }
   0xb   :  { %v150_v42 = vadd.f32 %v134_v33, %v72_v32  ;;  %v135_v47 = vadd.f32 %v263_v6, %v112_v37  ;;  %v75_v58 = vadd.f32 %v249_v2, %v52_v49  ;;  %v53_v59 = vmul.f32 %v244_v1, %v30_v44  ;;  %v35_v22 = vld [vmem:[%s466_s0 + $0x60] sm:$0xff]  ;;  %v98_v33 = vld [vmem:[%s467_s1 + $0x68] sm:$0xff]  ;;  %v99_v43 = vld [vmem:[%s467_s1 + $0x70] sm:$0xff] }
   0xc   :  { %v163_v40 = vmax.f32 %v147_v30, 0.0  ;;  %v164_v46 = vmax.f32 %v148_v35, 0.0  ;;  %v165_v52 = vmax.f32 %v149_v41, 0.0  ;;  %v115_v60 = vmul.f32 %v258_v5, %v92_v45  ;;  %v97_v27 = vld [vmem:[%s467_s1 + $0x60] sm:$0xff]  ;;  %v100_v49 = vld [vmem:[%s467_s1 + $0x78] sm:$0xff] }
   0xd   :  { %v166_v53 = vmax.f32 %v150_v42, 0.0  ;;  %v151_v57 = vadd.f32 %v135_v47, %v73_v36  ;;  %v152_v61 = vadd.f32 %v136_v54, %v74_v48  ;;  %v137_v62 = vadd.f32 %v263_v6, %v114_v55  ;;  %v38_v48 = vld [vmem:[%s466_s0 + $0x78] sm:$0xff] }
   0xe   :  { %179 = vst [vmem:[%s472_s6] sm:$0xff] %v163_v40  ;;  %180 = vst [vmem:[%s472_s6 + $0x8] sm:$0xff] %v164_v46  ;;  %v54_v63 = vmul.f32 %v244_v1, %v31_v50  ;;  %v116_v0 = vmul.f32 %v258_v5, %v93_v51  ;;  %v76_v8 = vadd.f32 %v249_v2, %v53_v59 }
   0xf   :  { %181 = vst [vmem:[%s472_s6 + $0x10] sm:$0xff] %v165_v52  ;;  %182 = vst [vmem:[%s472_s6 + $0x18] sm:$0xff] %v166_v53  ;;  %v167_v7 = vmax.f32 %v151_v57, 0.0  ;;  %v138_v9 = vadd.f32 %v263_v6, %v115_v60  ;;  %v55_v10 = vmul.f32 %v244_v1, %v32_v56  ;;  %v168_v13 = vmax.f32 %v152_v61, 0.0 }
  0x10   :  { %v153_v14 = vadd.f32 %v137_v62, %v75_v58  ;;  %v77_v15 = vadd.f32 %v249_v2, %v54_v63  ;;  %v139_v16 = vadd.f32 %v263_v6, %v116_v0  ;;  %v117_v20 = vmul.f32 %v258_v5, %v94_v3 }
  0x11   :  { %183 = vst [vmem:[%s472_s6 + $0x20] sm:$0xff] %v167_v7  ;;  %v154_v18 = vadd.f32 %v138_v9, %v76_v8  ;;  %v78_v19 = vadd.f32 %v249_v2, %v55_v10  ;;  %v56_v21 = vmul.f32 %v244_v1, %v33_v4  ;;  %184 = vst [vmem:[%s472_s6 + $0x28] sm:$0xff] %v168_v13 }
  0x12   :  { %v169_v23 = vmax.f32 %v153_v14, 0.0  ;;  %v155_v24 = vadd.f32 %v139_v16, %v77_v15  ;;  %v118_v25 = vmul.f32 %v258_v5, %v95_v11  ;;  %v57_v26 = vmul.f32 %v244_v1, %v34_v12 }
  0x13   :  { %v170_v29 = vmax.f32 %v154_v18, 0.0  ;;  %v140_v30 = vadd.f32 %v263_v6, %v117_v20  ;;  %v79_v31 = vadd.f32 %v249_v2, %v56_v21  ;;  %v119_v32 = vmul.f32 %v258_v5, %v96_v17 }
  0x14   :  { %185 = vst [vmem:[%s472_s6 + $0x30] sm:$0xff] %v169_v23  ;;  %v171_v35 = vmax.f32 %v155_v24, 0.0  ;;  %v141_v36 = vadd.f32 %v263_v6, %v118_v25  ;;  %v80_v37 = vadd.f32 %v249_v2, %v57_v26  ;;  %v58_v38 = vmul.f32 %v244_v1, %v35_v22 }
  0x15   :  { %186 = vst [vmem:[%s472_s6 + $0x38] sm:$0xff] %v170_v29  ;;  %v156_v39 = vadd.f32 %v140_v30, %v78_v19  ;;  %v142_v40 = vadd.f32 %v263_v6, %v119_v32  ;;  %v120_v41 = vmul.f32 %v258_v5, %v97_v27  ;;  %v59_v42 = vmul.f32 %v244_v1, %v36_v28 }
  0x16   :  { %187 = vst [vmem:[%s472_s6 + $0x40] sm:$0xff] %v171_v35  ;;  %v157_v44 = vadd.f32 %v141_v36, %v79_v31  ;;  %v81_v45 = vadd.f32 %v249_v2, %v58_v38  ;;  %v121_v46 = vmul.f32 %v258_v5, %v98_v33  ;;  %v60_v47 = vmul.f32 %v244_v1, %v37_v34 }
  0x17   :  { %v172_v50 = vmax.f32 %v156_v39, 0.0  ;;  %v158_v51 = vadd.f32 %v142_v40, %v80_v37  ;;  %v143_v52 = vadd.f32 %v263_v6, %v120_v41  ;;  %v82_v53 = vadd.f32 %v249_v2, %v59_v42 }
  0x18   :  { %v173_v54 = vmax.f32 %v157_v44, 0.0  ;;  %v144_v55 = vadd.f32 %v263_v6, %v121_v46  ;;  %v83_v56 = vadd.f32 %v249_v2, %v60_v47  ;;  %v122_v57 = vmul.f32 %v258_v5, %v99_v43 }
  0x19   :  { %188 = vst [vmem:[%s472_s6 + $0x48] sm:$0xff] %v172_v50  ;;  %v174_v58 = vmax.f32 %v158_v51, 0.0  ;;  %v159_v59 = vadd.f32 %v143_v52, %v81_v45  ;;  %v61_v60 = vmul.f32 %v244_v1, %v38_v48  ;;  %v123_v61 = vmul.f32 %v258_v5, %v100_v49 }
  0x1a   :  { %189 = vst [vmem:[%s472_s6 + $0x50] sm:$0xff] %v173_v54  ;;  %v160_v62 = vadd.f32 %v144_v55, %v82_v53  ;;  %v145_v63 = vadd.f32 %v263_v6, %v122_v57 }
  0x1b   :  { %190 = vst [vmem:[%s472_s6 + $0x58] sm:$0xff] %v174_v58  ;;  %v175_v0 = vmax.f32 %v159_v59, 0.0  ;;  %v84_v3 = vadd.f32 %v249_v2, %v61_v60  ;;  %v146_v4 = vadd.f32 %v263_v6, %v123_v61 }
  0x1c   :  { %v176_v7 = vmax.f32 %v160_v62, 0.0  ;;  %v161_v1 = vadd.f32 %v145_v63, %v83_v56 }
  0x1d   :  { %191 = vst [vmem:[%s472_s6 + $0x60] sm:$0xff] %v175_v0  ;;  %v162_v5 = vadd.f32 %v146_v4, %v84_v3 }
  0x1e   :  { %192 = vst [vmem:[%s472_s6 + $0x68] sm:$0xff] %v176_v7  ;;  %v177_v8 = vmax.f32 %v161_v1, 0.0 }
  0x1f   :  { %v178_v9 = vmax.f32 %v162_v5, 0.0 }
  0x20   :  { %193 = vst [vmem:[%s472_s6 + $0x70] sm:$0xff] %v177_v8 }
  0x21   :  { %194 = vst [vmem:[%s472_s6 + $0x78] sm:$0xff] %v178_v9 }

// kernel: restnet_down_block.3
= control target key start
LH: loop header
LB: loop body
LE: loop exit
PB: predicated region body
PF: predicated region fallthrough
CT: control target
= control target key end

     0   :  { %s2160_s18 = smov 0   ;;  %s2571_s0 = inlined_call_operand.vmem [shape: f32[2,18,18,8], index: 0, kind: input, shape index: {}]   ;;  %s2572_s1 = inlined_call_operand.vmem [shape: f32[8,8,128], index: 1, kind: input, shape index: {}]   ;;  %s2573_s2 = inlined_call_operand.vmem [shape: f32[8,256], index: 2, kind: input, shape index: {}]   ;;  %s2574_s3 = inlined_call_operand.vmem [shape: f32[2,64,128], index: 3, kind: output, shape index: {0}]   ;;  %s2575_s4 = inlined_call_operand.vmem [shape: f32[2,64,128], index: 4, kind: output, shape index: {1}]   ;;  %s2576_s5 = inlined_call_operand.vmem [shape: f32[2,8,128], index: 5, kind: output, shape index: {2}]  }
   0x1 LB: > { %s1777_s19 = sadd.s32 4294967295, %s2127_s18   ;;  %p1781_p0 = scmp.ge.s32.totalorder %s2127_s18, 1  ;;  %s2127_s18 = sphi %s2160_s18, %s16_s18  }
   0x2   : > { %p192_p1 = scmp.lt.s32.totalorder %s2127_s18, 3 }
   0x4   : > { %p193_p2 = pnand %p1781_p0, %p192_p1 }
   0x5   : > { %v1814_v0 = vld [vmem:[%s2572_s1 + $0x18] sm:$0xff] (!%p193_p2)  ;;  %p229_p3 = scmp.lt.s32.totalorder (!%p193_p2), %s1777_s19, 1  ;;  %v1823_v1 = vld [vmem:[%s2572_s1 + $0x20] sm:$0xff] (!%p193_p2)  ;;  %v1788_v2 = vld [vmem:[%s2572_s1 + $0x8] sm:$0xff] (!%p193_p2)  ;;  %vm343_vm0 = vcmask (!%p193_p2), 64512   ;;  %vm316_vm1 = vcmask (!%p193_p2), 1046528  }
   0x6   : > { %196 = sbr.rel (%p193_p2) target bundleno = 336 (0x150), region = 32  ;;  %1985 = vmatprep.subr.mxu0 (!%p193_p2), %v1814_v0  ;;  %1943 = vmatprep.subr.mxu1 (!%p193_p2), %v1788_v2  ;;  %v299_v3 = vld [vmem:[%s2572_s1] sm:$0xff] (!%p193_p2)  ;;  %v2207_v10 = vld [vmem:[%s2572_s1 + $0x28] sm:$0xff] (!%p193_p2)  ;;  %v2237_v24 = vld [vmem:[%s2572_s1 + $0x10] sm:$0xff] (!%p193_p2)  ;;  %vm1649_vm2 = vcmask (!%p193_p2), 1040384   ;;  %vm1651_vm3 = vcmask (!%p193_p2), 1041408  }
   0x7   : > { %1986 = vmatpush3.msra.mxu0 (!%p193_p2), %v1814_v0  ;;  %1944 = vmatpush3.msra.mxu1 (!%p193_p2), %v1788_v2  ;;  %vm1653_vm4 = vcmask (!%p193_p2), 1042432   ;;  %vm1655_vm5 = vcmask (!%p193_p2), 1043456  }
   0x8   : > { %1999 = vmatprep.subr.mxu0 (!%p193_p2), %v1823_v1  ;;  %1957 = vmatprep.subr.mxu1 (!%p193_p2), %v299_v3 }
   0xd   : > { %s2578_s19 = smov (!%p229_p3, %s1777_s19), 1 }
   0xe   : > { %s2111_s28 = smul.u32 432, %s2578_s19  ;;  %s1869_s21 = sshll.u32 %s2578_s19, 6 }
   0xf   : > { %s2539_s24 = scalar_lea.vmem %s2575_s4, %s1869_s21  ;;  %s2547_s27 = scalar_lea.vmem %s2574_s3, %s1869_s21 }
  0x10   : > { %s2186_s6 = scalar_lea.vmem %s2571_s0, %s2111_s28  ;;  %s1787_s28 = sshll.u32 %s2578_s19, 3 }
  0x11   : > { %v2189_v4 = vld [vmem:[%s2186_s6 + $0xd8] sm:$0xff]  ;;  %v2192_v5 = vld [vmem:[%s2186_s6 + $0xf0] sm:$0xff]  ;;  %v2195_v6 = vld [vmem:[%s2186_s6 + $0x8] sm:$0xff] }
  0x12   : > { %1987 = vmatprep.mubr.msk.f32.mxu0 %vm343_vm0, %v2189_v4  ;;  %v250_v7 = vld [vmem:[%s2186_s6 + $0x10] sm:$0x3]  ;;  %v317_v8 = vrot.slane %v2195_v6, 1  ;;  %v2202_v9 = vld [vmem:[%s2186_s6 + $0x20] sm:$0xff]  ;;  %v253_v12 = vld [vmem:[%s2186_s6 + $0x28] sm:$0x3] }
  0x13   : > { %1988 = vmatmul.mubr.msk.f32.vlgmr.msra.gmra.mrb[0].mxu0 %vm343_vm0, %v2192_v5  ;;  %v318_v11 = vrot.slane %v250_v7, 1  ;;  %v320_v13 = vrot.slane %v2202_v9, 1  ;;  %v2214_v14 = vld [vmem:[%s2186_s6 + $0x108] sm:$0xff]  ;;  %v321_v15 = vrot.slane %v253_v12, 1  ;;  %v2219_v16 = vld [vmem:[%s2186_s6 + $0x120] sm:$0xff]  ;;  %v2222_v17 = vld [vmem:[%s2186_s6 + $0x38] sm:$0xff] }
  0x14   : > { %2000 = vmatpush3.msra.mxu0 %v1823_v1  ;;  %1990 = vmatprep.mubr.msk.f32.mxu0 %vm343_vm0, %v2214_v14  ;;  %v256_v18 = vld [vmem:[%s2186_s6 + $0x40] sm:$0x3]  ;;  %v323_v20 = vrot.slane %v2222_v17, 1  ;;  %v2230_v22 = vld [vmem:[%s2186_s6 + $0x50] sm:$0xff]  ;;  %v259_v23 = vld [vmem:[%s2186_s6 + $0x58] sm:$0x3] }
  0x15   : > { %v319_v19 = vsel %vm316_vm1, %v317_v8, %v318_v11  ;;  %v324_v21 = vrot.slane %v256_v18, 1  ;;  %2013 = vmatprep.subr.mxu0 %v2207_v10  ;;  %v2243_v25 = vsel %vm316_vm1, %v320_v13, %v321_v15  ;;  %v326_v26 = vrot.slane %v2230_v22, 1  ;;  %v2247_v28 = vld [vmem:[%s2186_s6 + $0x138] sm:$0xff]  ;;  %v2250_v29 = vld [vmem:[%s2186_s6 + $0x68] sm:$0xff]  ;;  %v2253_v30 = vld [vmem:[%s2186_s6 + $0x80] sm:$0xff] }
  0x16   : > { %1945 = vmatprep.mubr.msk.f32.mxu1 %vm343_vm0, %v319_v19  ;;  %v327_v27 = vrot.slane %v259_v23, 1  ;;  %v262_v32 = vld [vmem:[%s2186_s6 + $0x70] sm:$0x3]  ;;  %v329_v33 = vrot.slane %v2250_v29, 1  ;;  %v265_v34 = vld [vmem:[%s2186_s6 + $0x88] sm:$0x3] }
  0x17   : > { %1946 = vmatmul.mubr.msk.f32.vlgmr.msra.gmra.mrb[0].mxu1 %vm343_vm0, %v2243_v25  ;;  %1991 = vmatmul.mubr.msk.f32.gmra.mrb[2].mxu0 %vm343_vm0, %v2219_v16  ;;  %v2262_v31 = vsel %vm316_vm1, %v323_v20, %v324_v21  ;;  %v2275_v36 = vld [vmem:[%s2186_s6 + $0x150] sm:$0xff]  ;;  %v330_v37 = vrot.slane %v262_v32, 1  ;;  %v332_v38 = vrot.slane %v2253_v30, 1  ;;  %v333_v39 = vrot.slane %v265_v34, 1  ;;  %v2279_v40 = vld [vmem:[%s2186_s6 + $0x98] sm:$0xff]  ;;  %v2285_v42 = vld [vmem:[%s2186_s6 + $0x168] sm:$0xff] }
  0x18   : > { %1958 = vmatpush3.msra.mxu1 %v299_v3  ;;  %1948 = vmatprep.mubr.msk.f32.mxu1 %vm343_vm0, %v2262_v31  ;;  %v2272_v35 = vsel %vm316_vm1, %v326_v26, %v327_v27  ;;  %v888_v41 = vrot.slane %v2189_v4, 1  ;;  %v268_v43 = vld [vmem:[%s2186_s6 + $0xa0] sm:$0x3]  ;;  %v335_v44 = vrot.slane %v2279_v40, 1  ;;  %v2290_v45 = vld [vmem:[%s2186_s6 + $0xb0] sm:$0xff]  ;;  %v2303_v50 = vld [vmem:[%s2186_s6 + $0xf8] sm:$0xff] }
  0x19   : > { %1993 = vmatprep.mubr.msk.f32.mxu0 %vm343_vm0, %v2247_v28  ;;  %1971 = vmatprep.subr.mxu1 %v2237_v24  ;;  %v2296_v46 = vsel %vm316_vm1, %v329_v33, %v330_v37  ;;  %v336_v47 = vrot.slane %v268_v43, 1  ;;  %v271_v48 = vld [vmem:[%s2186_s6 + $0xb8] sm:$0x3]  ;;  %v2300_v49 = vld [vmem:[%s2186_s6 + $0xe0] sm:$0xff]  ;;  %v891_v51 = vrot.slane %v2192_v5, 1  ;;  %v2312_v53 = vld [vmem:[%s2186_s6 + $0x110] sm:$0xff]  ;;  %v2319_v54 = vsel %vm316_vm1, %v332_v38, %v333_v39 }
  0x1a   : > { %v889_v52 = vrot.slane %v2300_v49, 1  ;;  %v2324_v55 = vld [vmem:[%s2186_s6 + $0x180] sm:$0xff]  ;;  %v338_v56 = vrot.slane %v2290_v45, 1  ;;  %v339_v57 = vrot.slane %v271_v48, 1  ;;  %v892_v58 = vrot.slane %v2303_v50, 1  ;;  %v2337_v61 = vld [vmem:[%s2186_s6 + $0x128] sm:$0xff] }
  0x1b   : > { %1949 = vmatmul.mubr.msk.f32.gmra.mrb[2].mxu1 %vm343_vm0, %v2272_v35  ;;  %1994 = vmatmul.mubr.msk.f32.gmra.mrb[4].mxu0 %vm343_vm0, %v2275_v36  ;;  %v2331_v59 = vsel %vm316_vm1, %v335_v44, %v336_v47  ;;  %v894_v62 = vrot.slane %v2214_v14, 1  ;;  %v895_v63 = vrot.slane %v2312_v53, 1  ;;  %v288_v0 = vld [vmem:[%s2186_s6 + $0x140] sm:$0xff]  ;;  %v897_v1 = vrot.slane %v2219_v16, 1  ;;  %v291_v7 = vld [vmem:[%s2186_s6 + $0x158] sm:$0xff]  ;;  %v294_v15 = vld [vmem:[%s2186_s6 + $0x170] sm:$0xff] }
  0x1c   : > { %1951 = vmatprep.mubr.msk.f32.mxu1 %vm343_vm0, %v2296_v46  ;;  %1996 = vmatprep.mubr.msk.f32.mxu0 %vm343_vm0, %v2285_v42  ;;  %v890_v60 = vsel %vm316_vm1, %v888_v41, %v889_v52  ;;  %v2352_v2 = vsel %vm316_vm1, %v338_v56, %v339_v57  ;;  %v893_v3 = vsel %vm316_vm1, %v891_v51, %v892_v58  ;;  %v898_v4 = vrot.slane %v2337_v61, 1  ;;  %v2360_v5 = vld [vmem:[%s2186_s6] sm:$0xff]  ;;  %v1841_v16 = vld [vmem:[%s2572_s1 + $0x30] sm:$0xff]  ;;  %v289_v18 = vld [vmem:[%s2186_s6 + $0x148] sm:$0x3] }
  0x1d   : > { %v900_v11 = vrot.slane %v2247_v28, 1  ;;  %v896_v12 = vsel %vm316_vm1, %v894_v62, %v895_v63  ;;  %v901_v14 = vrot.slane %v288_v0, 1  ;;  %v292_v19 = vld [vmem:[%s2186_s6 + $0x160] sm:$0x3]  ;;  %v903_v21 = vrot.slane %v2275_v36, 1  ;;  %v251_v27 = vld [vmem:[%s2186_s6 + $0x18] sm:$0xff] }
  0x1e   : > { %v906_v23 = vrot.slane %v2285_v42, 1  ;;  %v899_v28 = vsel %vm316_vm1, %v897_v1, %v898_v4  ;;  %v904_v32 = vrot.slane %v291_v7, 1  ;;  %v295_v34 = vld [vmem:[%s2186_s6 + $0x178] sm:$0x3]  ;;  %v254_v37 = vld [vmem:[%s2186_s6 + $0x30] sm:$0xff]  ;;  %v907_v39 = vrot.slane %v294_v15, 1 }
  0x1f   : > { %1952 = vmatmul.mubr.msk.f32.gmra.mrb[4].mxu1 %vm343_vm0, %v2319_v54  ;;  %1997 = vmatmul.mubr.msk.f32.gmra.mrb[6].mxu0 %vm343_vm0, %v2324_v55  ;;  %v297_v36 = vld [vmem:[%s2186_s6 + $0x188] sm:$0xff]  ;;  %v1418_v41 = vrot.slane %v289_v18, 1  ;;  %v298_v42 = vld [vmem:[%s2186_s6 + $0x190] sm:$0x3]  ;;  %v1420_v47 = vrot.slane %v292_v19, 1  ;;  %v909_v48 = vrot.slane %v2324_v55, 1 }
  0x20   : > { %1954 = vmatprep.mubr.msk.f32.mxu1 %vm343_vm0, %v2331_v59  ;;  %2001 = vmatprep.mubr.msk.f32.mxu0 %vm343_vm0, %v890_v60  ;;  %v1427_v43 = vld [vmem:[%s2573_s2 + $0x8] sm:$0xff]  ;;  %v1422_v57 = vrot.slane %v295_v34, 1  ;;  %v905_v62 = vsel %vm316_vm1, %v903_v21, %v904_v32  ;;  %v910_v0 = vrot.slane %v297_v36, 1  ;;  %v1424_v1 = vrot.slane %v298_v42, 1  ;;  %v266_v18 = vld [vmem:[%s2186_s6 + $0x90] sm:$0xff]  ;;  %v1426_v6 = vld [vmem:[%s2573_s2] sm:$0xff] }
  0x21   : > { %v2398_v51 = vsel %vm316_vm1, %v901_v14, %v1418_v41  ;;  %v257_v60 = vld [vmem:[%s2186_s6 + $0x48] sm:$0xff]  ;;  %v2405_v55 = vsel %vm316_vm1, %v904_v32, %v1420_v47  ;;  %v908_v7 = vsel %vm316_vm1, %v906_v23, %v907_v39  ;;  %v594_v15 = vrot.slane %v2360_v5, 1  ;;  %v280_v40 = vld [vmem:[%s2186_s6 + $0x100] sm:$0x3] }
  0x22   : > { %v596_v19 = vrot.slane %v251_v27, 1  ;;  %v269_v21 = vld [vmem:[%s2186_s6 + $0xa8] sm:$0xff]  ;;  %v598_v23 = vrot.slane %v254_v37, 1  ;;  %v600_v32 = vrot.slane %v257_v60, 1 }
  0x23   : > { %1955 = vmatmul.mubr.msk.f32.gmra.mrb[6].mxu1 %vm343_vm0, %v2352_v2  ;;  %2002 = vmatmul.mubr.msk.f32.vlgmr.msra.gmra.mrb[0].mxu0 %vm343_vm0, %v893_v3  ;;  %v260_v3 = vld [vmem:[%s2186_s6 + $0x60] sm:$0xff] }
  0x24   : > { %2014 = vmatpush3.msra.mxu0 %v2207_v10  ;;  %1959 = vmatprep.mubr.msk.f32.mxu1 %vm343_vm0, %v2360_v5  ;;  %v902_v10 = vsel %vm316_vm1, %v900_v11, %v901_v14  ;;  %v2414_v11 = vsel %vm316_vm1, %v910_v0, %v1424_v1  ;;  %v911_v14 = vsel %vm316_vm1, %v909_v48, %v910_v0  ;;  %v1850_v5 = vld [vmem:[%s2572_s1 + $0x38] sm:$0xff]  ;;  %v602_v34 = vrot.slane %v260_v3, 1 }
  0x25   : > { %2004 = vmatprep.mubr.msk.f32.mxu0 %vm343_vm0, %v896_v12  ;;  %2027 = vmatprep.subr.mxu0 %v1841_v16  ;;  %v263_v12 = vld [vmem:[%s2186_s6 + $0x78] sm:$0xff] }
  0x26   : > { %v604_v9 = vrot.slane %v263_v12, 1  ;;  %v603_v17 = vsel %vm316_vm1, %v602_v34, %v329_v33  ;;  %v277_v33 = vld [vmem:[%s2186_s6 + $0xe8] sm:$0x3] }
  0x27   : > { %1960 = vmatmul.mubr.msk.f32.vlgmr.msra.gmra.mrb[0].mxu1 %vm343_vm0, %v251_v27  ;;  %2005 = vmatmul.mubr.msk.f32.gmra.mrb[2].mxu0 %vm343_vm0, %v899_v28  ;;  %v595_v28 = vsel %vm316_vm1, %v594_v15, %v317_v8  ;;  %v599_v8 = vsel %vm316_vm1, %v598_v23, %v323_v20  ;;  %v608_v20 = vrot.slane %v269_v21, 1 }
  0x28   : > { %1972 = vmatpush3.msra.mxu1 %v2237_v24  ;;  %1962 = vmatprep.mubr.msk.f32.mxu1 %vm343_vm0, %v254_v37  ;;  %v2411_v24 = vsel %vm316_vm1, %v907_v39, %v1422_v57  ;;  %v605_v22 = vsel %vm316_vm1, %v604_v9, %v332_v38  ;;  %v1410_v38 = vrot.slane %v277_v33, 1  ;;  %v274_v39 = vld [vmem:[%s2186_s6 + $0xd0] sm:$0x3] }
  0x29   : > { %2007 = vmatprep.mubr.msk.f32.mxu0 %vm343_vm0, %v902_v10  ;;  %1444 = vmatprep.subr.mxu1 %v1427_v43  ;;  %v609_v30 = vsel %vm316_vm1, %v608_v20, %v338_v56  ;;  %v273_v56 = vld [vmem:[%s2186_s6 + $0xc8] sm:$0xff]  ;;  %v1164_v36 = vrot.slane %v274_v39, 1 }
  0x2a   : > { %v1411_v45 = vsel %vm316_vm1, %v889_v52, %v1410_v38  ;;  %v1163_v52 = vrot.slane %v273_v56, 1 }
  0x2b   : > { %1963 = vmatmul.mubr.msk.f32.gmra.mrb[2].mxu1 %vm343_vm0, %v257_v60  ;;  %2008 = vmatmul.mubr.msk.f32.gmra.mrb[4].mxu0 %vm343_vm0, %v905_v62 }
  0x2c   : > { %1965 = vmatprep.mubr.msk.f32.mxu1 %vm343_vm0, %v260_v3  ;;  %2010 = vmatprep.mubr.msk.f32.mxu0 %vm343_vm0, %v908_v7  ;;  %v1165_v50 = vsel %vm316_vm1, %v1163_v52, %v1164_v36 }
  0x2f   : > { %1966 = vmatmul.mubr.msk.f32.gmra.mrb[4].mxu1 %vm343_vm0, %v263_v12  ;;  %2011 = vmatmul.mubr.msk.f32.gmra.mrb[6].mxu0 %vm343_vm0, %v911_v14 }
  0x30   : > { %1968 = vmatprep.mubr.msk.f32.mxu1 %vm343_vm0, %v266_v18  ;;  %2015 = vmatprep.mubr.msk.f32.mxu0 %vm343_vm0, %v251_v27  ;;  %v597_v27 = vsel %vm316_vm1, %v596_v19, %v320_v13  ;;  %v601_v13 = vsel %vm316_vm1, %v600_v32, %v326_v26  ;;  %v272_v26 = vld [vmem:[%s2186_s6 + $0xc0] sm:$0xff] }
  0x31   : > { %v1283_v53 = vrot.slane %v272_v26, 1 }
  0x33   : > { %1969 = vmatmul.mubr.msk.f32.gmra.mrb[6].mxu1 %vm343_vm0, %v269_v21  ;;  %2016 = vmatmul.mubr.msk.f32.vlgmr.msra.gmra.mrb[0].mxu0 %vm343_vm0, %v254_v37  ;;  %v1412_v37 = vrot.slane %v280_v40, 1 }
  0x34   : > { %2028 = vmatpush3.msra.mxu0 %v1841_v16  ;;  %1973 = vmatprep.mubr.msk.f32.mxu1 %vm343_vm0, %v595_v28  ;;  %v606_v16 = vrot.slane %v266_v18, 1 }
  0x35   : > { %2018 = vmatprep.mubr.msk.f32.mxu0 %vm343_vm0, %v257_v60  ;;  %2041 = vmatprep.subr.mxu0 %v1850_v5 }
  0x36   : > { %v607_v29 = vsel %vm316_vm1, %v606_v16, %v335_v44  ;;  %v2129_v44 = vmov 0.0  }
  0x37   : > { %1974 = vmatmul.mubr.msk.f32.vlgmr.msra.gmra.mrb[0].mxu1 %vm343_vm0, %v597_v27  ;;  %2019 = vmatmul.mubr.msk.f32.gmra.mrb[2].mxu0 %vm343_vm0, %v260_v3 }
  0x38   : > { %1445 = vmatpush1.msra.mxu1 %v1426_v6  ;;  %1976 = vmatprep.mubr.msk.f32.mxu1 %vm343_vm0, %v599_v8 }
  0x39   : > { %2021 = vmatprep.mubr.msk.f32.mxu0 %vm343_vm0, %v263_v12 }
  0x3b   : > { %1977 = vmatmul.mubr.msk.f32.gmra.mrb[2].mxu1 %vm343_vm0, %v601_v13  ;;  %2022 = vmatmul.mubr.msk.f32.gmra.mrb[4].mxu0 %vm343_vm0, %v266_v18 }
  0x3c   : > { %1979 = vmatprep.mubr.msk.f32.mxu1 %vm343_vm0, %v603_v17  ;;  %2024 = vmatprep.mubr.msk.f32.mxu0 %vm343_vm0, %v269_v21 }
  0x3f   : > { %1980 = vmatmul.mubr.msk.f32.gmra.mrb[4].mxu1 %vm343_vm0, %v605_v22  ;;  %2025 = vmatmul.mubr.msk.f32.gmra.mrb[6].mxu0 %vm343_vm0, %v272_v26 }
  0x40   : > { %1982 = vmatprep.mubr.msk.f32.mxu1 %vm343_vm0, %v607_v29  ;;  %2029 = vmatprep.mubr.msk.f32.mxu0 %vm343_vm0, %v2243_v25  ;;  %v283_v25 = vld [vmem:[%s2186_s6 + $0x118] sm:$0x3] }
  0x41   : > { %v1414_v49 = vrot.slane %v283_v25, 1 }
  0x43   : > { %1983 = vmatmul.mubr.msk.f32.gmra.mrb[6].mxu1 %vm343_vm0, %v609_v30  ;;  %2030 = vmatmul.mubr.msk.f32.vlgmr.msra.gmra.mrb[0].mxu0 %vm343_vm0, %v2262_v31  ;;  %v1413_v31 = vsel %vm316_vm1, %v892_v58, %v1412_v37 }
  0x44   : > { %2042 = vmatpush3.msra.mxu0 %v1850_v5  ;;  %1508 = vmatprep.mubr.f32.mxu1 %v2129_v44 }
  0x45   : > { %2032 = vmatprep.mubr.msk.f32.mxu0 %vm343_vm0, %v2272_v35  ;;  %v286_v35 = vld [vmem:[%s2186_s6 + $0x130] sm:$0x3]  ;;  %s247_s6 = scalar_lea.vmem %s2576_s5, %s1787_s28 }
  0x47   : > { %1859 = vmatmul.mubr.msk.f32.vlgmr.msra.gmra.mrb[8].mxu1 %vm343_vm0, %v1411_v45  ;;  %2033 = vmatmul.mubr.msk.f32.gmra.mrb[2].mxu0 %vm343_vm0, %v2296_v46  ;;  %v1415_v46 = vsel %vm316_vm1, %v895_v63, %v1414_v49 }
  0x48   : > { %1514 = vmatprep.mubr.f32.mxu1 %v2129_v44  ;;  %2035 = vmatprep.mubr.msk.f32.mxu0 %vm343_vm0, %v2319_v54  ;;  %v1416_v54 = vrot.slane %v286_v35, 1 }
  0x4a   : > { %v1417_v58 = vsel %vm316_vm1, %v898_v4, %v1416_v54 }
  0x4b   : > { %1860 = vmatmul.mubr.msk.f32.gmra.mrb[10].mxu1 %vm343_vm0, %v1413_v31  ;;  %2036 = vmatmul.mubr.msk.f32.gmra.mrb[4].mxu0 %vm343_vm0, %v2331_v59  ;;  %v1284_v59 = vsel %vm316_vm1, %v1283_v53, %v1163_v52 }
  0x4c   : > { %1520 = vmatprep.mubr.f32.mxu1 %v2129_v44  ;;  %2038 = vmatprep.mubr.msk.f32.mxu0 %vm343_vm0, %v2352_v2 }
  0x4f   : > { %1861 = vmatmul.mubr.msk.f32.gmra.mrb[12].mxu1 %vm343_vm0, %v1415_v46  ;;  %2039 = vmatmul.mubr.msk.f32.gmra.mrb[6].mxu0 %vm343_vm0, %v1165_v50 }
  0x50   : > { %1526 = vmatprep.mubr.f32.mxu1 %v2129_v44  ;;  %2043 = vmatprep.mubr.msk.f32.mxu0 %vm343_vm0, %v597_v27 }
  0x53   : > { %1862 = vmatmul.mubr.msk.f32.gmra.mrb[14].mxu1 %vm343_vm0, %v1417_v58  ;;  %2044 = vmatmul.mubr.msk.f32.vlgmr.msra.gmra.mrb[0].mxu0 %vm343_vm0, %v599_v8 }
  0x54   : > { %1532 = vmatprep.mubr.f32.mxu1 %v2129_v44  ;;  %2046 = vmatprep.mubr.msk.f32.mxu0 %vm343_vm0, %v601_v13 }
  0x57   : > { %1863 = vmatmul.mubr.msk.f32.gmra.mrb[16].mxu1 %vm343_vm0, %v2398_v51  ;;  %2047 = vmatmul.mubr.msk.f32.gmra.mrb[2].mxu0 %vm343_vm0, %v603_v17 }
  0x58   : > { %1538 = vmatprep.mubr.f32.mxu1 %v2129_v44  ;;  %2049 = vmatprep.mubr.msk.f32.mxu0 %vm343_vm0, %v605_v22 }
  0x5b   : > { %1864 = vmatmul.mubr.msk.f32.gmra.mrb[18].mxu1 %vm343_vm0, %v2405_v55  ;;  %2050 = vmatmul.mubr.msk.f32.gmra.mrb[4].mxu0 %vm343_vm0, %v607_v29 }
  0x5c   : > { %1544 = vmatprep.mubr.f32.mxu1 %v2129_v44  ;;  %2052 = vmatprep.mubr.msk.f32.mxu0 %vm343_vm0, %v609_v30 }
  0x5f   : > { %1865 = vmatmul.mubr.msk.f32.gmra.mrb[20].mxu1 %vm343_vm0, %v2411_v24  ;;  %2053 = vmatmul.mubr.msk.f32.gmra.mrb[6].mxu0 %vm343_vm0, %v1284_v59 }
  0x60   : > { %1550 = vmatprep.mubr.f32.mxu1 %v2129_v44 }
  0x63   : > { %1866 = vmatmul.mubr.msk.f32.gmra.mrb[22].mxu1 %vm343_vm0, %v2414_v11 }
 0x10a   : > { %v1975_v61 = vpop.f32.mrb[0].mxu1 }
 0x10b   : > { %v694_v63 = vpop.f32.mrb[1].mxu1 }
 0x10e   : > { %v1978_v2 = vpop.f32.mrb[2].mxu1 }
 0x10f   : > { %v704_v4 = vpop.f32.mrb[3].mxu1 }
 0x112   : > { %v1981_v41 = vpop.f32.mrb[4].mxu1 }
 0x113   : > { %v714_v42 = vpop.f32.mrb[5].mxu1 }
 0x116   : > { %v2531_v10 = vpop.f32.mrb[6].mxu1 }
 0x117   : > { %v2534_v43 = vpop.f32.mrb[7].mxu1 }
 0x11a   : > { %v1510_v47 = vpop.f32.mrb[8].mxu1 }
 0x11b   : > { %v1512_v48 = vpop.f32.mrb[9].mxu1 }
 0x11c   : > { %1573 = vst [vmem:[%s2539_s24] sm:$0xff] %v1512_v48  ;;  %v1628_v60 = vmul.f32 %v1512_v48, %v1512_v48 }
 0x11e   : > { %v1516_v51 = vpop.f32.mrb[10].mxu1 }
 0x11f   : > { %v1518_v57 = vpop.f32.mrb[11].mxu1 }
 0x120   : > { %1574 = vst [vmem:[%s2539_s24 + $0x8] sm:$0xff] %v1518_v57  ;;  %v1615_v62 = vadd.f32 %v1518_v57, %v1512_v48  ;;  %v1629_v0 = vmul.f32 %v1518_v57, %v1518_v57 }
 0x122   : > { %v1636_v55 = vadd.f32 %v1629_v0, %v1628_v60  ;;  %v1522_v1 = vpop.f32.mrb[12].mxu1 }
 0x123   : > { %v1524_v3 = vpop.f32.mrb[13].mxu1 }
 0x124   : > { %1575 = vst [vmem:[%s2539_s24 + $0x10] sm:$0xff] %v1524_v3  ;;  %v1616_v7 = vadd.f32 %v1615_v62, %v1524_v3  ;;  %v1630_v24 = vmul.f32 %v1524_v3, %v1524_v3 }
 0x126   : > { %v1637_v11 = vadd.f32 %v1636_v55, %v1630_v24  ;;  %v1528_v12 = vpop.f32.mrb[14].mxu1  ;;  %v2045_v14 = vpop.f32.mrb[0].mxu0 }
 0x127   : > { %v2055_v15 = vadd.f32 %v2045_v14, %v1975_v61  ;;  %v1530_v18 = vpop.f32.mrb[15].mxu1  ;;  %v1355_v19 = vpop.f32.mrb[1].mxu0 }
 0x128   : > { %1576 = vst [vmem:[%s2539_s24 + $0x18] sm:$0xff] %v1530_v18  ;;  %v1617_v21 = vadd.f32 %v1616_v7, %v1530_v18  ;;  %v1631_v23 = vmul.f32 %v1530_v18, %v1530_v18  ;;  %v2056_v28 = vadd.f32 %v1355_v19, %v694_v63 }
 0x129   : > { %v1558_v5 = vadd.f32 %v2055_v15, %v1516_v51 }
 0x12a   : > { %v1638_v32 = vadd.f32 %v1637_v11, %v1631_v23  ;;  %v1557_v27 = vadd.f32 %v2056_v28, %v1510_v47  ;;  %v1534_v34 = vpop.f32.mrb[16].mxu1  ;;  %v2048_v6 = vpop.f32.mrb[2].mxu0 }
 0x12b   : > { %1566 = vst [vmem:[%s2547_s27 + $0x8] sm:$0xff] %v1558_v5  ;;  %v1595_v8 = vmul.f32 %v1558_v5, %v1558_v5  ;;  %v2057_v9 = vadd.f32 %v2048_v6, %v1978_v2  ;;  %v1536_v13 = vpop.f32.mrb[17].mxu1  ;;  %v1365_v16 = vpop.f32.mrb[3].mxu0 }
 0x12c   : > { %1565 = vst [vmem:[%s2547_s27] sm:$0xff] %v1557_v27  ;;  %v1581_v17 = vadd.f32 %v1558_v5, %v1557_v27  ;;  %v1594_v20 = vmul.f32 %v1557_v27, %v1557_v27  ;;  %1577 = vst [vmem:[%s2539_s24 + $0x20] sm:$0xff] %v1536_v13  ;;  %v1618_v22 = vadd.f32 %v1617_v21, %v1536_v13 }
 0x12d   : > { %v1632_v26 = vmul.f32 %v1536_v13, %v1536_v13  ;;  %v1560_v29 = vadd.f32 %v2057_v9, %v1528_v12  ;;  %v2058_v33 = vadd.f32 %v1365_v16, %v704_v4 }
 0x12e   : > { %v1602_v30 = vadd.f32 %v1595_v8, %v1594_v20  ;;  %v1540_v40 = vpop.f32.mrb[18].mxu1  ;;  %v2051_v44 = vpop.f32.mrb[4].mxu0 }
 0x12f   : > { %v1639_v38 = vadd.f32 %v1638_v32, %v1632_v26  ;;  %1568 = vst [vmem:[%s2547_s27 + $0x18] sm:$0xff] %v1560_v29  ;;  %v1559_v45 = vadd.f32 %v2058_v33, %v1522_v1  ;;  %v2059_v37 = vadd.f32 %v2051_v44, %v1981_v41  ;;  %v1542_v25 = vpop.f32.mrb[19].mxu1  ;;  %v1375_v56 = vpop.f32.mrb[5].mxu0  ;;  %v1597_v53 = vmul.f32 %v1560_v29, %v1560_v29 }
 0x130   : > { %1578 = vst [vmem:[%s2539_s24 + $0x28] sm:$0xff] %v1542_v25  ;;  %v1619_v39 = vadd.f32 %v1618_v22, %v1542_v25  ;;  %v1633_v31 = vmul.f32 %v1542_v25, %v1542_v25  ;;  %v2060_v49 = vadd.f32 %v1375_v56, %v714_v42 }
 0x131   : > { %1567 = vst [vmem:[%s2547_s27 + $0x10] sm:$0xff] %v1559_v45  ;;  %v1582_v52 = vadd.f32 %v1581_v17, %v1559_v45  ;;  %v1596_v36 = vmul.f32 %v1559_v45, %v1559_v45  ;;  %v1562_v35 = vadd.f32 %v2059_v37, %v1540_v40 }
 0x132   : > { %v1640_v46 = vadd.f32 %v1639_v38, %v1633_v31  ;;  %v1561_v50 = vadd.f32 %v2060_v49, %v1534_v34  ;;  %v1546_v54 = vpop.f32.mrb[20].mxu1  ;;  %v2054_v58 = vpop.f32.mrb[6].mxu0 }
 0x133   : > { %v1603_v59 = vadd.f32 %v1602_v30, %v1596_v36  ;;  %1570 = vst [vmem:[%s2547_s27 + $0x28] sm:$0xff] %v1562_v35  ;;  %v1583_v61 = vadd.f32 %v1582_v52, %v1560_v29  ;;  %v2061_v63 = vadd.f32 %v2054_v58, %v2531_v10  ;;  %v1548_v2 = vpop.f32.mrb[21].mxu1  ;;  %v1385_v4 = vpop.f32.mrb[7].mxu0  ;;  %v1599_v55 = vmul.f32 %v1562_v35, %v1562_v35 }
 0x134   : > { %1569 = vst [vmem:[%s2547_s27 + $0x20] sm:$0xff] %v1561_v50  ;;  %v1598_v41 = vmul.f32 %v1561_v50, %v1561_v50  ;;  %1579 = vst [vmem:[%s2539_s24 + $0x30] sm:$0xff] %v1548_v2  ;;  %v1620_v42 = vadd.f32 %v1619_v39, %v1548_v2  ;;  %v1634_v47 = vmul.f32 %v1548_v2, %v1548_v2 }
 0x135   : > { %v2062_v48 = vadd.f32 %v1385_v4, %v2534_v43  ;;  %v1584_v51 = vadd.f32 %v1583_v61, %v1561_v50  ;;  %v1604_v57 = vadd.f32 %v1603_v59, %v1597_v53 }
 0x136   : > { %v1641_v60 = vadd.f32 %v1640_v46, %v1634_v47  ;;  %v1552_v0 = vpop.f32.mrb[22].mxu1 }
 0x137   : > { %v1563_v62 = vadd.f32 %v2062_v48, %v1546_v54  ;;  %v1605_v1 = vadd.f32 %v1604_v57, %v1598_v41  ;;  %v1564_v10 = vadd.f32 %v2061_v63, %v1552_v0  ;;  %v1585_v3 = vadd.f32 %v1584_v51, %v1562_v35  ;;  %v1554_v7 = vpop.f32.mrb[23].mxu1 }
 0x138   : > { %1580 = vst [vmem:[%s2539_s24 + $0x38] sm:$0xff] %v1554_v7  ;;  %v1621_v11 = vadd.f32 %v1620_v42, %v1554_v7  ;;  %v1635_v12 = vmul.f32 %v1554_v7, %v1554_v7 }
 0x139   : > { %1571 = vst [vmem:[%s2547_s27 + $0x30] sm:$0xff] %v1563_v62  ;;  %v1600_v24 = vmul.f32 %v1563_v62, %v1563_v62  ;;  %1572 = vst [vmem:[%s2547_s27 + $0x38] sm:$0xff] %v1564_v10  ;;  %v1586_v14 = vadd.f32 %v1585_v3, %v1563_v62  ;;  %v1606_v15 = vadd.f32 %v1605_v1, %v1599_v55 }
 0x13a   : > { %v1622_v43 = vrot.slane %v1621_v11, 4  ;;  %v1642_v18 = vadd.f32 %v1641_v60, %v1635_v12  ;;  %v1601_v21 = vmul.f32 %v1564_v10, %v1564_v10 }
 0x13b   : > { %v1587_v19 = vadd.f32 %v1586_v14, %v1564_v10  ;;  %v1607_v23 = vadd.f32 %v1606_v15, %v1600_v24 }
 0x13c   : > { %v1623_v28 = vadd.f32 %v1622_v43, %v1621_v11  ;;  %v1643_v5 = vrot.slane %v1642_v18, 4 }
 0x13d   : > { %v1588_v32 = vrot.slane %v1587_v19, 4  ;;  %v1608_v27 = vadd.f32 %v1607_v23, %v1601_v21 }
 0x13e   : > { %v1624_v34 = vrot.slane %v1623_v28, 2  ;;  %v1644_v6 = vadd.f32 %v1643_v5, %v1642_v18 }
 0x13f   : > { %v1589_v8 = vadd.f32 %v1588_v32, %v1587_v19  ;;  %v1609_v9 = vrot.slane %v1608_v27, 4 }
 0x140   : > { %v1645_v13 = vrot.slane %v1644_v6, 2  ;;  %v1625_v20 = vadd.f32 %v1624_v34, %v1623_v28 }
 0x141   : > { %v1590_v16 = vrot.slane %v1589_v8, 2  ;;  %v1610_v17 = vadd.f32 %v1609_v9, %v1608_v27 }
 0x142   : > { %v1646_v29 = vadd.f32 %v1645_v13, %v1644_v6  ;;  %v1626_v38 = vrot.slane %v1625_v20, 1 }
 0x143   : > { %v1591_v22 = vadd.f32 %v1590_v16, %v1589_v8  ;;  %v1611_v26 = vrot.slane %v1610_v17, 2 }
 0x144   : > { %v1647_v44 = vrot.slane %v1646_v29, 1  ;;  %v1627_v25 = vadd.f32 %v1626_v38, %v1625_v20 }
 0x145   : > { %v1592_v33 = vrot.slane %v1591_v22, 1  ;;  %v1612_v30 = vadd.f32 %v1611_v26, %v1610_v17 }
 0x146   : > { %v1648_v56 = vadd.f32 %v1647_v44, %v1646_v29 }
 0x147   : > { %v1613_v40 = vrot.slane %v1612_v30, 1  ;;  %v1593_v45 = vadd.f32 %v1592_v33, %v1591_v22 }
 0x149   : > { %v1614_v37 = vadd.f32 %v1613_v40, %v1612_v30 }
 0x14b   : > { %v1650_v39 = vsel %vm1649_vm2, %v1593_v45, %v1614_v37 }
 0x14c   : > { %v1652_v31 = vsel %vm1651_vm3, %v1650_v39, %v1627_v25 }
 0x14d   : > { %v1654_v49 = vsel %vm1653_vm4, %v1652_v31, %v1648_v56 }
 0x14e   : > { %v1656_v52 = vsel %vm1655_vm5, %v1654_v49, 0.0 }
 0x14f   : > { %1657 = vst [vmem:[%s247_s6] sm:$0xff] %v1656_v52 }
 0x150 PF: > { %s16_s18 = sadd.s32 1, %s2127_s18  }
 0x151   : > { %p13_p4 = scmp.ge.s32.totalorder %s16_s18, 4  }
 0x153   :  { %15 = sbr.rel (!%p13_p4) target bundleno = 1 (0x1), region = 93 }

// kernel: restnet_down_block.4
= control target key start
LH: loop header
LB: loop body
LE: loop exit
PB: predicated region body
PF: predicated region fallthrough
CT: control target
= control target key end

     0   :  { %s2954_s18 = smov 0   ;;  %s3792_s0 = inlined_call_operand.vmem [shape: f32[2,10,10,128], index: 0, kind: input, shape index: {}]   ;;  %s3793_s1 = inlined_call_operand.vmem [shape: f32[9,128,128], index: 1, kind: input, shape index: {}]   ;;  %s3794_s2 = inlined_call_operand.vmem [shape: f32[1,1,128], index: 2, kind: input, shape index: {}]   ;;  %s3795_s3 = inlined_call_operand.vmem [shape: f32[1,1,128], index: 3, kind: input, shape index: {}]   ;;  %s3796_s4 = inlined_call_operand.vmem [shape: f32[2,64,128], index: 4, kind: output, shape index: {0}]   ;;  %s3797_s5 = inlined_call_operand.vmem [shape: f32[2,8,128], index: 5, kind: output, shape index: {1}]  }
   0x1 LB: > { %s1761_s19 = sadd.s32 4294967295, %s2921_s18   ;;  %p1765_p0 = scmp.ge.s32.totalorder %s2921_s18, 1  ;;  %s2921_s18 = sphi %s2954_s18, %s16_s18  }
   0x2   : > { %p190_p1 = scmp.lt.s32.totalorder %s2921_s18, 3 }
   0x4   : > { %p191_p2 = pnand %p1765_p0, %p190_p1 }
   0x5   : > { %v1772_v0 = vld [vmem:[%s3793_s1 + $0x80] sm:$0xff] (!%p191_p2)  ;;  %v1773_v1 = vld [vmem:[%s3793_s1 + $0x88] sm:$0xff] (!%p191_p2)  ;;  %p222_p3 = scmp.lt.s32.totalorder (!%p191_p2), %s1761_s19, 1  ;;  %v1774_v5 = vld [vmem:[%s3793_s1 + $0x90] sm:$0xff] (!%p191_p2)  ;;  %v2923_v7 = vmov (!%p191_p2), 0.0   ;;  %v256_v18 = vlaneseq (!%p191_p2)  ;;  %vm405_vm2 = vcmask (!%p191_p2), 1046528  }
   0x6   : > { %194 = sbr.rel (%p191_p2) target bundleno = 417 (0x1a1), region = 36  ;;  %v1835_v2 = vld [vmem:[%s3793_s1 + $0x200] sm:$0xff] (!%p191_p2)  ;;  %v2537_v3 = vpack.c.bf16 (!%p191_p2), %v1773_v1, %v1772_v0  ;;  %v1836_v4 = vld [vmem:[%s3793_s1 + $0x208] sm:$0xff] (!%p191_p2)  ;;  %v1775_v6 = vld [vmem:[%s3793_s1 + $0x98] sm:$0xff] (!%p191_p2)  ;;  %v2981_v8 = vrot.slane (!%p191_p2), %v2923_v7, 1  ;;  %vm665_vm3 = vcmask (!%p191_p2), 1045504  }
   0x7   : > { %v2665_v9 = vpack.c.bf16 (!%p191_p2), %v1836_v4, %v1835_v2  ;;  %v2541_v10 = vpack.c.bf16 (!%p191_p2), %v1775_v6, %v1774_v5  ;;  %v1837_v11 = vld [vmem:[%s3793_s1 + $0x210] sm:$0xff] (!%p191_p2)  ;;  %v1838_v12 = vld [vmem:[%s3793_s1 + $0x218] sm:$0xff] (!%p191_p2)  ;;  %v1776_v13 = vld [vmem:[%s3793_s1 + $0xa0] sm:$0xff] (!%p191_p2)  ;;  %v3022_v25 = vshrl.u32 (!%p191_p2), %v256_v18, 7  ;;  %vm1670_vm4 = vcmask (!%p191_p2), 1040384  }
   0x8   : > { %2538 = vmatprep.subr.bf16.mxu1 (!%p191_p2), %v2537_v3  ;;  %v2669_v14 = vpack.c.bf16 (!%p191_p2), %v1838_v12, %v1837_v11  ;;  %v1777_v15 = vld [vmem:[%s3793_s1 + $0xa8] sm:$0xff] (!%p191_p2)  ;;  %v1839_v16 = vld [vmem:[%s3793_s1 + $0x220] sm:$0xff] (!%p191_p2)  ;;  %2173 = vmatprep.mubr.f32.mxu1 (!%p191_p2), %v2981_v8  ;;  %v1778_v21 = vld [vmem:[%s3793_s1 + $0xb0] sm:$0xff] (!%p191_p2)  ;;  %vm1672_vm5 = vcmask (!%p191_p2), 1041408  }
   0x9   : > { %v1840_v17 = vld [vmem:[%s3793_s1 + $0x228] sm:$0xff] (!%p191_p2)  ;;  %2666 = vmatprep.subr.bf16.mxu0 (!%p191_p2), %v2665_v9  ;;  %2540 = vmatpush3.bf16.msra.mxu1 (!%p191_p2), %v2537_v3  ;;  %v2545_v19 = vpack.c.bf16 (!%p191_p2), %v1777_v15, %v1776_v13  ;;  %v1779_v22 = vld [vmem:[%s3793_s1 + $0xb8] sm:$0xff] (!%p191_p2)  ;;  %v1841_v23 = vld [vmem:[%s3793_s1 + $0x230] sm:$0xff] (!%p191_p2)  ;;  %v3039_v34 = vadd.s32 (!%p191_p2), 8, %v3022_v25  ;;  %vm259_vm0 = vcmp.ge.s32.totalorder (!%p191_p2), %v3022_v25, 1 }
   0xa   : > { %2668 = vmatpush3.bf16.msra.mxu0 (!%p191_p2), %v2665_v9  ;;  %2542 = vmatprep.subr.bf16.mxu1 (!%p191_p2), %v2541_v10  ;;  %v2673_v20 = vpack.c.bf16 (!%p191_p2), %v1840_v17, %v1839_v16  ;;  %v1842_v24 = vld [vmem:[%s3793_s1 + $0x238] sm:$0xff] (!%p191_p2)  ;;  %v2549_v26 = vpack.c.bf16 (!%p191_p2), %v1779_v22, %v1778_v21  ;;  %v1780_v28 = vld [vmem:[%s3793_s1 + $0xc0] sm:$0xff] (!%p191_p2)  ;;  %v1781_v29 = vld [vmem:[%s3793_s1 + $0xc8] sm:$0xff] (!%p191_p2) }
   0xb   : > { %2670 = vmatprep.subr.bf16.mxu0 (!%p191_p2), %v2669_v14  ;;  %v2677_v27 = vpack.c.bf16 (!%p191_p2), %v1842_v24, %v1841_v23  ;;  %v1843_v30 = vld [vmem:[%s3793_s1 + $0x240] sm:$0xff] (!%p191_p2)  ;;  %v1844_v31 = vld [vmem:[%s3793_s1 + $0x248] sm:$0xff] (!%p191_p2)  ;;  %v2553_v37 = vpack.c.bf16 (!%p191_p2), %v1781_v29, %v1780_v28  ;;  %v1782_v43 = vld [vmem:[%s3793_s1 + $0xd0] sm:$0xff] (!%p191_p2)  ;;  %vm266_vm1 = vcmp.le.s32.totalorder (!%p191_p2), %v3039_v34, 8 }
   0xc   : > { %v3044_v35 = vld [vmem:[%s3794_s2] ss:$0 sm:$0xff] (!%p191_p2)  ;;  %v2681_v42 = vpack.c.bf16 (!%p191_p2), %v1844_v31, %v1843_v30  ;;  %v1783_v44 = vld [vmem:[%s3793_s1 + $0xd8] sm:$0xff] (!%p191_p2)  ;;  %v1845_v47 = vld [vmem:[%s3793_s1 + $0x250] sm:$0xff] (!%p191_p2) }
   0xd   : > { %s3799_s19 = smov (!%p222_p3, %s1761_s19), 1  ;;  %2544 = vmatpush3.bf16.msra.mxu1 %v2541_v10  ;;  %v3049_v36 = vld [vmem:[%s3795_s3] ss:$0 sm:$0xff]  ;;  %v1846_v48 = vld [vmem:[%s3793_s1 + $0x258] sm:$0xff]  ;;  %v2557_v53 = vpack.c.bf16 %v1783_v44, %v1782_v43  ;;  %v1785_v55 = vld [vmem:[%s3793_s1 + $0xe8] sm:$0xff] }
   0xe   : > { %s2905_s21 = smul.u32 160, %s3799_s19  ;;  %2672 = vmatpush3.bf16.msra.mxu0 %v2669_v14  ;;  %2546 = vmatprep.subr.bf16.mxu1 %v2545_v19  ;;  %v1784_v54 = vld [vmem:[%s3793_s1 + $0xe0] sm:$0xff]  ;;  %v2685_v59 = vpack.c.bf16 %v1846_v48, %v1845_v47  ;;  %v1848_v60 = vld [vmem:[%s3793_s1 + $0x268] sm:$0xff]  ;;  %v1786_v61 = vld [vmem:[%s3793_s1 + $0xf0] sm:$0xff]  ;;  %s1924_s17 = sshll.u32 %s3799_s19, 6 }
   0xf   : > { %2674 = vmatprep.subr.bf16.mxu0 %v2673_v20  ;;  %v1847_v56 = vld [vmem:[%s3793_s1 + $0x260] sm:$0xff]  ;;  %v1787_v62 = vld [vmem:[%s3793_s1 + $0xf8] sm:$0xff]  ;;  %v1849_v0 = vld [vmem:[%s3793_s1 + $0x270] sm:$0xff]  ;;  %v2561_v12 = vpack.c.bf16 %v1785_v55, %v1784_v54  ;;  %s1769_s22 = sshll.u32 %s3799_s19, 3 }
  0x10   : > { %s3020_s7 = scalar_lea.vmem %s3792_s0, %s2905_s21  ;;  %v1850_v1 = vld [vmem:[%s3793_s1 + $0x278] sm:$0xff]  ;;  %v373_v5 = vld [vmem:[%s3793_s1] sm:$0xff]  ;;  %v374_v6 = vld [vmem:[%s3793_s1 + $0x8] sm:$0xff]  ;;  %v2689_v13 = vpack.c.bf16 %v1848_v60, %v1847_v56  ;;  %v3121_v14 = vpack.c.bf16 %v1787_v62, %v1786_v61  ;;  %s235_s25 = scalar_lea.vmem %s3797_s5, %s1769_s22 }
  0x11   : > { %v238_v32 = vld [vmem:[%s3020_s7 + $0x10] sm:$0xff]  ;;  %v239_v33 = vld [vmem:[%s3020_s7 + $0x18] sm:$0x3]  ;;  %2548 = vmatpush3.bf16.msra.mxu1 %v2545_v19  ;;  %v240_v40 = vld [vmem:[%s3020_s7 + $0x20] sm:$0xff]  ;;  %v3130_v18 = vpack.c.bf16 %v1850_v1, %v1849_v0  ;;  %v3143_v24 = vpack.c.bf16 %v374_v6, %v373_v5 }
  0x12   : > { %2676 = vmatpush3.bf16.msra.mxu0 %v2673_v20  ;;  %2550 = vmatprep.subr.bf16.mxu1 %v2549_v26  ;;  %v280_v38 = vmul.f32 %v3044_v35, %v238_v32  ;;  %v281_v39 = vmul.f32 %v3044_v35, %v239_v33  ;;  %v241_v41 = vld [vmem:[%s3020_s7 + $0x28] sm:$0x3]  ;;  %v282_v45 = vmul.f32 %v3044_v35, %v240_v40  ;;  %v242_v11 = vld [vmem:[%s3020_s7 + $0x30] sm:$0xff]  ;;  %v1851_v15 = vld [vmem:[%s3793_s1 + $0x280] sm:$0xff] }
  0x13   : > { %2678 = vmatprep.subr.bf16.mxu0 %v2677_v27  ;;  %v283_v46 = vmul.f32 %v3044_v35, %v241_v41  ;;  %v1852_v16 = vld [vmem:[%s3793_s1 + $0x288] sm:$0xff]  ;;  %v243_v17 = vld [vmem:[%s3020_s7 + $0x38] sm:$0x3]  ;;  %v284_v21 = vmul.f32 %v3044_v35, %v242_v11  ;;  %v244_v22 = vld [vmem:[%s3020_s7 + $0x40] sm:$0xff] }
  0x14   : > { %v307_v49 = vadd.f32 %v3049_v36, %v280_v38  ;;  %v308_v50 = vadd.f32 %v3049_v36, %v281_v39  ;;  %v309_v51 = vadd.f32 %v3049_v36, %v282_v45  ;;  %v245_v23 = vld [vmem:[%s3020_s7 + $0x48] sm:$0x3]  ;;  %v286_v28 = vmul.f32 %v3044_v35, %v244_v22  ;;  %v246_v29 = vld [vmem:[%s3020_s7 + $0x50] sm:$0xff]  ;;  %v247_v33 = vld [vmem:[%s3020_s7 + $0x58] sm:$0x3] }
  0x15   : > { %2552 = vmatpush3.bf16.msra.mxu1 %v2549_v26  ;;  %v310_v52 = vadd.f32 %v3049_v36, %v283_v46  ;;  %v3153_v30 = vpack.c.bf16 %v1852_v16, %v1851_v15  ;;  %v311_v31 = vadd.f32 %v3049_v36, %v284_v21  ;;  %v287_v32 = vmul.f32 %v3044_v35, %v245_v23  ;;  %v249_v43 = vld [vmem:[%s3020_s7 + $0x68] sm:$0x3]  ;;  %v375_v45 = vld [vmem:[%s3793_s1 + $0x10] sm:$0xff]  ;;  %v376_v46 = vld [vmem:[%s3793_s1 + $0x18] sm:$0xff] }
  0x16   : > { %2680 = vmatpush3.bf16.msra.mxu0 %v2677_v27  ;;  %2554 = vmatprep.subr.bf16.mxu1 %v2553_v37  ;;  %v3084_v57 = vmax.f32 %v307_v49, 0.0  ;;  %v328_v58 = vmax.f32 %v308_v50, 0.0  ;;  %v3095_v63 = vmax.f32 %v309_v51, 0.0  ;;  %v285_v27 = vmul.f32 %v3044_v35, %v243_v17  ;;  %v1853_v50 = vld [vmem:[%s3793_s1 + $0x290] sm:$0xff]  ;;  %v1854_v55 = vld [vmem:[%s3793_s1 + $0x298] sm:$0xff]  ;;  %v377_v56 = vld [vmem:[%s3793_s1 + $0x20] sm:$0xff] }
  0x17   : > { %2682 = vmatprep.subr.bf16.mxu0 %v2681_v42  ;;  %v330_v4 = vmax.f32 %v310_v52, 0.0  ;;  %v313_v40 = vadd.f32 %v3049_v36, %v286_v28  ;;  %v289_v41 = vmul.f32 %v3044_v35, %v247_v33  ;;  %v3172_v47 = vmax.f32 %v311_v31, 0.0  ;;  %v250_v6 = vld [vmem:[%s3020_s7 + $0x70] sm:$0xff]  ;;  %v252_v22 = vld [vmem:[%s3020_s7 + $0x80] sm:$0xff]  ;;  %v253_v31 = vld [vmem:[%s3020_s7 + $0x88] sm:$0x3] }
  0x18   : > { %v3106_v2 = vsel %vm259_vm0, %v3084_v57, 0.0  ;;  %v3110_v3 = vsel %vm266_vm1, %v328_v58, 0.0  ;;  %v3138_v20 = vsel %vm259_vm0, %v3095_v63, 0.0  ;;  %v312_v39 = vadd.f32 %v3049_v36, %v285_v27  ;;  %v378_v58 = vld [vmem:[%s3793_s1 + $0x28] sm:$0xff]  ;;  %v1859_v34 = vld [vmem:[%s3793_s1 + $0x2c0] sm:$0xff]  ;;  %v1920_v25 = vld [vmem:[%s3793_s1 + $0x470] sm:$0xff] }
  0x19   : > { %2556 = vmatpush3.bf16.msra.mxu1 %v2553_v37  ;;  %v409_v9 = vrot.slane %v3106_v2, 1  ;;  %v410_v10 = vrot.slane %v3110_v3, 1  ;;  %v3148_v26 = vsel %vm266_vm1, %v330_v4, 0.0  ;;  %v288_v37 = vmul.f32 %v3044_v35, %v246_v29 }
  0x1a   : > { %2684 = vmatpush3.bf16.msra.mxu0 %v2681_v42  ;;  %2558 = vmatprep.subr.bf16.mxu1 %v2557_v53  ;;  %v412_v38 = vrot.slane %v3138_v20, 1  ;;  %v248_v42 = vld [vmem:[%s3020_s7 + $0x60] sm:$0xff]  ;;  %v413_v44 = vrot.slane %v3148_v26, 1  ;;  %v314_v48 = vadd.f32 %v3049_v36, %v287_v32  ;;  %v332_v51 = vmax.f32 %v312_v39, 0.0 }
  0x1b   : > { %2686 = vmatprep.subr.bf16.mxu0 %v2685_v59  ;;  %v3133_v19 = vsel %vm405_vm2, %v409_v9, %v410_v10  ;;  %v315_v49 = vadd.f32 %v3049_v36, %v288_v37  ;;  %v3179_v52 = vmax.f32 %v313_v40, 0.0  ;;  %v290_v54 = vmul.f32 %v3044_v35, %v248_v42  ;;  %v1856_v42 = vld [vmem:[%s3793_s1 + $0x2a8] sm:$0xff] }
  0x1c   : > { %2349 = vmatprep.mubr.f32.mxu0 %v3133_v19  ;;  %v334_v60 = vmax.f32 %v314_v48, 0.0  ;;  %v291_v62 = vmul.f32 %v3044_v35, %v249_v43  ;;  %v3201_v0 = vpack.c.bf16 %v376_v46, %v375_v45  ;;  %v3205_v1 = vsel %vm266_vm1, %v332_v51, 0.0 }
  0x1d   : > { %2560 = vmatpush3.bf16.msra.mxu1 %v2557_v53  ;;  %v316_v53 = vadd.f32 %v3049_v36, %v289_v41  ;;  %v3197_v61 = vmax.f32 %v315_v49, 0.0  ;;  %v3210_v4 = vsel %vm259_vm0, %v3179_v52, 0.0  ;;  %v416_v10 = vrot.slane %v3205_v1, 1  ;;  %v1855_v41 = vld [vmem:[%s3793_s1 + $0x2a0] sm:$0xff] }
  0x1e   : > { %2688 = vmatpush3.bf16.msra.mxu0 %v2685_v59  ;;  %2562 = vmatprep.subr.bf16.mxu1 %v2561_v12  ;;  %v3195_v59 = vsel %vm259_vm0, %v3172_v47, 0.0  ;;  %v3218_v11 = vsel %vm266_vm1, %v334_v60, 0.0  ;;  %v2701_v15 = vpack.c.bf16 %v1854_v55, %v1853_v50  ;;  %v3226_v16 = vpack.c.bf16 %v378_v58, %v377_v56  ;;  %v379_v55 = vld [vmem:[%s3793_s1 + $0x30] sm:$0xff]  ;;  %v380_v56 = vld [vmem:[%s3793_s1 + $0x38] sm:$0xff] }
  0x1f   : > { %2690 = vmatprep.subr.bf16.mxu0 %v2689_v13  ;;  %v336_v5 = vmax.f32 %v316_v53, 0.0  ;;  %v415_v9 = vrot.slane %v3195_v59, 1  ;;  %v317_v21 = vadd.f32 %v3049_v36, %v290_v54  ;;  %v3236_v23 = vsel %vm405_vm2, %v412_v38, %v413_v44  ;;  %v1857_v58 = vld [vmem:[%s3793_s1 + $0x2b0] sm:$0xff] }
  0x20   : > { %v418_v27 = vrot.slane %v3210_v4, 1  ;;  %v419_v28 = vrot.slane %v3218_v11, 1  ;;  %v318_v29 = vadd.f32 %v3049_v36, %v291_v62  ;;  %v295_v46 = vmul.f32 %v3044_v35, %v253_v31 }
  0x21   : > { %2564 = vmatpush3.bf16.msra.mxu1 %v2561_v12  ;;  %v3223_v12 = vsel %vm259_vm0, %v3197_v61, 0.0  ;;  %v3230_v17 = vsel %vm266_vm1, %v336_v5, 0.0  ;;  %v3245_v33 = vmax.f32 %v317_v21, 0.0  ;;  %v3251_v38 = vsel %vm405_vm2, %v415_v9, %v416_v10 }
  0x22   : > { %2692 = vmatpush3.bf16.msra.mxu0 %v2689_v13  ;;  %2566 = vmatprep.subr.bf16.mxu1 %v3121_v14  ;;  %v251_v13 = vld [vmem:[%s3020_s7 + $0x78] sm:$0x3]  ;;  %v421_v32 = vrot.slane %v3223_v12, 1  ;;  %v422_v39 = vrot.slane %v3230_v17, 1  ;;  %v338_v40 = vmax.f32 %v318_v29, 0.0  ;;  %v322_v53 = vadd.f32 %v3049_v36, %v295_v46  ;;  %v381_v29 = vld [vmem:[%s3793_s1 + $0x40] sm:$0xff]  ;;  %s231_s7 = scalar_lea.vmem %s3796_s4, %s1924_s17 }
  0x23   : > { %2694 = vmatprep.subr.bf16.mxu0 %v3130_v18  ;;  %v293_v37 = vmul.f32 %v3044_v35, %v251_v13  ;;  %v3265_v43 = vsel %vm259_vm0, %v3245_v33, 0.0  ;;  %v2705_v54 = vpack.c.bf16 %v1856_v42, %v1855_v41  ;;  %v2581_v21 = vpack.c.bf16 %v380_v56, %v379_v55  ;;  %v384_v42 = vld [vmem:[%s3793_s1 + $0x58] sm:$0xff]  ;;  %v387_v55 = vld [vmem:[%s3793_s1 + $0x70] sm:$0xff] }
  0x24   : > { %v3277_v48 = vsel %vm266_vm1, %v338_v40, 0.0  ;;  %v424_v49 = vrot.slane %v3265_v43, 1  ;;  %v342_v5 = vmax.f32 %v322_v53, 0.0  ;;  %v388_v56 = vld [vmem:[%s3793_s1 + $0x78] sm:$0xff] }
  0x25   : > { %2568 = vmatpush3.bf16.msra.mxu1 %v3121_v14  ;;  %v292_v14 = vmul.f32 %v3044_v35, %v250_v6  ;;  %v320_v45 = vadd.f32 %v3049_v36, %v293_v37  ;;  %v3316_v6 = vsel %vm405_vm2, %v421_v32, %v422_v39  ;;  %v1860_v32 = vld [vmem:[%s3793_s1 + $0x2c8] sm:$0xff]  ;;  %v669_v37 = vrot.slane %v3106_v2, 2  ;;  %v1861_v2 = vld [vmem:[%s3793_s1 + $0x2d0] sm:$0xff] }
  0x26   : > { %2696 = vmatpush3.bf16.msra.mxu0 %v3130_v18  ;;  %2570 = vmatprep.subr.bf16.mxu1 %v3143_v24  ;;  %v294_v18 = vmul.f32 %v3044_v35, %v252_v22  ;;  %v425_v35 = vrot.slane %v3277_v48, 1  ;;  %v3331_v22 = vsel %vm266_vm1, %v342_v5, 0.0  ;;  %v670_v39 = vrot.slane %v3110_v3, 2  ;;  %v1862_v3 = vld [vmem:[%s3793_s1 + $0x2d8] sm:$0xff] }
  0x27   : > { %2698 = vmatprep.subr.bf16.mxu0 %v3153_v30  ;;  %v319_v44 = vadd.f32 %v3049_v36, %v292_v14  ;;  %v340_v51 = vmax.f32 %v320_v45, 0.0  ;;  %v961_v31 = vrot.slane %v3331_v22, 1  ;;  %v2713_v41 = vpack.c.bf16 %v1860_v32, %v1859_v34  ;;  %v1797_v32 = vld [vmem:[%s3793_s1 + $0x110] sm:$0xff] }
  0x28   : > { %2174 = vmatmul.mubr.f32.vlgmr.msra.gmra.mrb[0].mxu1 %v3133_v19  ;;  %v3273_v19 = vsel %vm405_vm2, %v418_v27, %v419_v28  ;;  %v321_v50 = vadd.f32 %v3049_v36, %v294_v18  ;;  %v1858_v36 = vld [vmem:[%s3793_s1 + $0x2b8] sm:$0xff]  ;;  %v2717_v46 = vpack.c.bf16 %v1862_v3, %v1861_v2  ;;  %v2597_v5 = vpack.c.bf16 %v388_v56, %v387_v55  ;;  %v1801_v55 = vld [vmem:[%s3793_s1 + $0x130] sm:$0xff] }
  0x29   : > { %2572 = vmatpush3.bf16.msra.mxu1 %v3143_v24  ;;  %2350 = vmatmul.mubr.f32.vlgmr.msra.gmra.mrb[0].mxu0 %v3236_v23  ;;  %v3284_v24 = vmax.f32 %v319_v44, 0.0  ;;  %v3311_v62 = vsel %vm266_vm1, %v340_v51, 0.0  ;;  %v2709_v28 = vpack.c.bf16 %v1858_v36, %v1857_v58  ;;  %v3377_v44 = vsel %vm665_vm3, %v669_v37, %v670_v39  ;;  %v1864_v51 = vld [vmem:[%s3793_s1 + $0x2e8] sm:$0xff]  ;;  %v1865_v58 = vld [vmem:[%s3793_s1 + $0x2f0] sm:$0xff]  ;;  %v1866_v36 = vld [vmem:[%s3793_s1 + $0x2f8] sm:$0xff] }
  0x2a   : > { %2700 = vmatpush3.bf16.msra.mxu0 %v3153_v30  ;;  %2574 = vmatprep.subr.bf16.mxu1 %v3201_v0  ;;  %v3294_v30 = vmax.f32 %v321_v50, 0.0  ;;  %v428_v10 = vrot.slane %v3311_v62, 1  ;;  %v386_v50 = vld [vmem:[%s3793_s1 + $0x68] sm:$0xff]  ;;  %v1798_v37 = vld [vmem:[%s3793_s1 + $0x118] sm:$0xff]  ;;  %v1869_v39 = vld [vmem:[%s3793_s1 + $0x310] sm:$0xff]  ;;  %v679_v2 = vrot.slane %v3218_v11, 2 }
  0x2b   : > { %2702 = vmatprep.subr.bf16.mxu0 %v2701_v15  ;;  %2176 = vmatprep.mubr.f32.mxu1 %v3236_v23  ;;  %v3307_v60 = vsel %vm259_vm0, %v3284_v24, 0.0 }
  0x2c   : > { %2352 = vmatprep.mubr.f32.mxu0 %v3251_v38  ;;  %2177 = vmatmul.mubr.f32.gmra.mrb[2].mxu1 %v3251_v38  ;;  %v427_v9 = vrot.slane %v3307_v60, 1  ;;  %v3323_v13 = vsel %vm259_vm0, %v3294_v30, 0.0  ;;  %v687_v56 = vrot.slane %v3307_v60, 2  ;;  %v1804_v60 = vld [vmem:[%s3793_s1 + $0x148] sm:$0xff] }
  0x2d   : > { %2576 = vmatpush3.bf16.msra.mxu1 %v3201_v0  ;;  %2353 = vmatmul.mubr.f32.gmra.mrb[2].mxu0 %v3273_v19  ;;  %v3327_v0 = vsel %vm405_vm2, %v424_v49, %v425_v35  ;;  %v960_v27 = vrot.slane %v3323_v13, 1  ;;  %v385_v49 = vld [vmem:[%s3793_s1 + $0x60] sm:$0xff] }
  0x2e   : > { %2704 = vmatpush3.bf16.msra.mxu0 %v2701_v15  ;;  %2578 = vmatprep.subr.bf16.mxu1 %v3226_v16  ;;  %v382_v15 = vld [vmem:[%s3793_s1 + $0x48] sm:$0xff]  ;;  %v3353_v14 = vsel %vm405_vm2, %v427_v9, %v428_v10  ;;  %v1863_v35 = vld [vmem:[%s3793_s1 + $0x2e0] sm:$0xff]  ;;  %v2593_v53 = vpack.c.bf16 %v386_v50, %v385_v49  ;;  %v2725_v9 = vpack.c.bf16 %v1866_v36, %v1865_v58  ;;  %v682_v49 = vrot.slane %v3230_v17, 2  ;;  %v1873_v17 = vld [vmem:[%s3793_s1 + $0x330] sm:$0xff] }
  0x2f   : > { %2706 = vmatprep.subr.bf16.mxu0 %v2705_v54  ;;  %2179 = vmatprep.mubr.f32.mxu1 %v3273_v19  ;;  %v2585_v40 = vpack.c.bf16 %v382_v15, %v381_v29  ;;  %v3358_v18 = vsel %vm405_vm2, %v960_v27, %v961_v31  ;;  %v1795_v10 = vld [vmem:[%s3793_s1 + $0x100] sm:$0xff]  ;;  %v672_v29 = vrot.slane %v3138_v20, 2  ;;  %v673_v15 = vrot.slane %v3148_v26, 2  ;;  %v1870_v20 = vld [vmem:[%s3793_s1 + $0x318] sm:$0xff] }
  0x30   : > { %2355 = vmatprep.mubr.f32.mxu0 %v3316_v6  ;;  %2180 = vmatmul.mubr.f32.gmra.mrb[4].mxu1 %v3316_v6  ;;  %v1867_v27 = vld [vmem:[%s3793_s1 + $0x300] sm:$0xff]  ;;  %v675_v26 = vrot.slane %v3195_v59, 2  ;;  %v2733_v3 = vpack.c.bf16 %v1870_v20, %v1869_v39  ;;  %v1800_v59 = vld [vmem:[%s3793_s1 + $0x128] sm:$0xff]  ;;  %v688_v58 = vrot.slane %v3311_v62, 2  ;;  %v1878_v39 = vld [vmem:[%s3793_s1 + $0x358] sm:$0xff] }
  0x31   : > { %2580 = vmatpush3.bf16.msra.mxu1 %v3226_v16  ;;  %2356 = vmatmul.mubr.f32.gmra.mrb[4].mxu0 %v3327_v0  ;;  %v383_v16 = vld [vmem:[%s3793_s1 + $0x50] sm:$0xff]  ;;  %v1875_v62 = vld [vmem:[%s3793_s1 + $0x340] sm:$0xff] }
  0x32   : > { %2708 = vmatpush3.bf16.msra.mxu0 %v2705_v54  ;;  %2582 = vmatprep.subr.bf16.mxu1 %v2581_v21  ;;  %v2589_v45 = vpack.c.bf16 %v384_v42, %v383_v16  ;;  %v2721_v54 = vpack.c.bf16 %v1864_v51, %v1863_v35  ;;  %v2605_v16 = vpack.c.bf16 %v1798_v37, %v1797_v32  ;;  %v678_v42 = vrot.slane %v3210_v4, 2  ;;  %v1872_v4 = vld [vmem:[%s3793_s1 + $0x328] sm:$0xff]  ;;  %v1877_v37 = vld [vmem:[%s3793_s1 + $0x350] sm:$0xff] }
  0x33   : > { %2710 = vmatprep.subr.bf16.mxu0 %v2709_v28  ;;  %2182 = vmatprep.mubr.f32.mxu1 %v3327_v0  ;;  %v684_v51 = vrot.slane %v3265_v43, 2  ;;  %v1874_v43 = vld [vmem:[%s3793_s1 + $0x338] sm:$0xff]  ;;  %v3530_v32 = vrot.slane %v2923_v7, 2 }
  0x34   : > { %2358 = vmatprep.mubr.f32.mxu0 %v3353_v14  ;;  %2183 = vmatmul.mubr.f32.gmra.mrb[6].mxu1 %v3353_v14  ;;  %v3460_v35 = vsel %vm665_vm3, %v678_v42, %v679_v2  ;;  %v1879_v42 = vld [vmem:[%s3793_s1 + $0x360] sm:$0xff]  ;;  %v1880_v2 = vld [vmem:[%s3793_s1 + $0x368] sm:$0xff] }
  0x35   : > { %2584 = vmatpush3.bf16.msra.mxu1 %v2581_v21  ;;  %2359 = vmatmul.mubr.f32.gmra.mrb[6].mxu0 %v3358_v18  ;;  %v1796_v21 = vld [vmem:[%s3793_s1 + $0x108] sm:$0xff] }
  0x36   : > { %2712 = vmatpush3.bf16.msra.mxu0 %v2709_v28  ;;  %2586 = vmatprep.subr.bf16.mxu1 %v2585_v40  ;;  %v1868_v28 = vld [vmem:[%s3793_s1 + $0x308] sm:$0xff]  ;;  %v2601_v31 = vpack.c.bf16 %v1796_v21, %v1795_v10  ;;  %v1095_v10 = vrot.slane %v3331_v22, 2  ;;  %v2741_v21 = vpack.c.bf16 %v1874_v43, %v1873_v17  ;;  %v3515_v22 = vsel %vm665_vm3, %v687_v56, %v688_v58  ;;  %v1813_v43 = vld [vmem:[%s3793_s1 + $0x190] sm:$0xff]  ;;  %v1814_v56 = vld [vmem:[%s3793_s1 + $0x198] sm:$0xff] }
  0x37   : > { %2714 = vmatprep.subr.bf16.mxu0 %v2713_v41  ;;  %2217 = vmatprep.mubr.f32.mxu1 %v2923_v7  ;;  %v2729_v34 = vpack.c.bf16 %v1868_v28, %v1867_v27  ;;  %v1803_v27 = vld [vmem:[%s3793_s1 + $0x140] sm:$0xff]  ;;  %v1892_v58 = vld [vmem:[%s3793_s1 + $0x390] sm:$0xff] }
  0x38   : > { %2393 = vmatprep.mubr.f32.mxu0 %v3377_v44  ;;  %v2617_v28 = vpack.c.bf16 %v1804_v60, %v1803_v27  ;;  %v1816_v27 = vld [vmem:[%s3793_s1 + $0x1a8] sm:$0xff]  ;;  %v1894_v60 = vld [vmem:[%s3793_s1 + $0x3a0] sm:$0xff] }
  0x39   : > { %2588 = vmatpush3.bf16.msra.mxu1 %v2585_v40  ;;  %v676_v40 = vrot.slane %v3205_v1, 2  ;;  %v1871_v1 = vld [vmem:[%s3793_s1 + $0x320] sm:$0xff] }
  0x3a   : > { %2716 = vmatpush3.bf16.msra.mxu0 %v2713_v41  ;;  %2590 = vmatprep.subr.bf16.mxu1 %v2589_v45  ;;  %v3434_v41 = vsel %vm665_vm3, %v672_v29, %v673_v15 }
  0x3b   : > { %2718 = vmatprep.subr.bf16.mxu0 %v2717_v46  ;;  %v3455_v11 = vsel %vm665_vm3, %v675_v26, %v676_v40  ;;  %v2749_v26 = vpack.c.bf16 %v1878_v39, %v1877_v37  ;;  %v1807_v40 = vld [vmem:[%s3793_s1 + $0x160] sm:$0xff] }
  0x3d   : > { %2592 = vmatpush3.bf16.msra.mxu1 %v2589_v45  ;;  %v1799_v45 = vld [vmem:[%s3793_s1 + $0x120] sm:$0xff] }
  0x3e   : > { %2720 = vmatpush3.bf16.msra.mxu0 %v2717_v46  ;;  %2594 = vmatprep.subr.bf16.mxu1 %v2593_v53  ;;  %v681_v46 = vrot.slane %v3223_v12, 2  ;;  %v2609_v50 = vpack.c.bf16 %v1800_v59, %v1799_v45  ;;  %v1802_v12 = vld [vmem:[%s3793_s1 + $0x138] sm:$0xff]  ;;  %v2753_v45 = vpack.c.bf16 %v1880_v2, %v1879_v42  ;;  %v1809_v59 = vld [vmem:[%s3793_s1 + $0x170] sm:$0xff] }
  0x3f   : > { %2722 = vmatprep.subr.bf16.mxu0 %v2721_v54  ;;  %v2613_v36 = vpack.c.bf16 %v1802_v12, %v1801_v55  ;;  %v1891_v55 = vld [vmem:[%s3793_s1 + $0x388] sm:$0xff] }
  0x41   : > { %2596 = vmatpush3.bf16.msra.mxu1 %v2593_v53  ;;  %v685_v53 = vrot.slane %v3277_v48, 2  ;;  %v3485_v48 = vsel %vm665_vm3, %v681_v46, %v682_v49  ;;  %v1882_v46 = vld [vmem:[%s3793_s1 + $0x378] sm:$0xff] }
  0x42   : > { %2724 = vmatpush3.bf16.msra.mxu0 %v2721_v54  ;;  %2598 = vmatprep.subr.bf16.mxu1 %v2597_v5  ;;  %v2737_v54 = vpack.c.bf16 %v1872_v4, %v1871_v1  ;;  %v1810_v1 = vld [vmem:[%s3793_s1 + $0x178] sm:$0xff]  ;;  %v1881_v4 = vld [vmem:[%s3793_s1 + $0x370] sm:$0xff] }
  0x43   : > { %2726 = vmatprep.subr.bf16.mxu0 %v2725_v9  ;;  %v2629_v49 = vpack.c.bf16 %v1810_v1, %v1809_v59  ;;  %v1900_v59 = vld [vmem:[%s3793_s1 + $0x3d0] sm:$0xff]  ;;  %v1901_v1 = vld [vmem:[%s3793_s1 + $0x3d8] sm:$0xff] }
  0x45   : > { %2600 = vmatpush3.bf16.msra.mxu1 %v2597_v5  ;;  %v3490_v5 = vsel %vm665_vm3, %v684_v51, %v685_v53  ;;  %v1811_v51 = vld [vmem:[%s3793_s1 + $0x180] sm:$0xff]  ;;  %v1812_v53 = vld [vmem:[%s3793_s1 + $0x188] sm:$0xff] }
  0x46   : > { %2728 = vmatpush3.bf16.msra.mxu0 %v2725_v9  ;;  %2602 = vmatprep.subr.bf16.mxu1 %v2601_v31  ;;  %v1094_v9 = vrot.slane %v3323_v13, 2  ;;  %v1876_v13 = vld [vmem:[%s3793_s1 + $0x348] sm:$0xff]  ;;  %v2633_v12 = vpack.c.bf16 %v1812_v53, %v1811_v51 }
  0x47   : > { %2730 = vmatprep.subr.bf16.mxu0 %v2729_v34  ;;  %v2745_v15 = vpack.c.bf16 %v1876_v13, %v1875_v62  ;;  %v1895_v62 = vld [vmem:[%s3793_s1 + $0x3a8] sm:$0xff] }
  0x48   : > { %2218 = vmatmul.mubr.msk.f32.vlgmr.msra.gmra.mrb[0].mxu1 %vm259_vm0, %v3084_v57  ;;  %v3518_v29 = vsel %vm665_vm3, %v1094_v9, %v1095_v10  ;;  %v2637_v9 = vpack.c.bf16 %v1814_v56, %v1813_v43  ;;  %v1903_v51 = vld [vmem:[%s3793_s1 + $0x3e8] sm:$0xff]  ;;  %v1906_v56 = vld [vmem:[%s3793_s1 + $0x400] sm:$0xff] }
  0x49   : > { %2604 = vmatpush3.bf16.msra.mxu1 %v2601_v31  ;;  %2394 = vmatmul.mubr.f32.vlgmr.msra.gmra.mrb[0].mxu0 %v3434_v41  ;;  %v1805_v31 = vld [vmem:[%s3793_s1 + $0x150] sm:$0xff] }
  0x4a   : > { %2732 = vmatpush3.bf16.msra.mxu0 %v2729_v34  ;;  %2606 = vmatprep.subr.bf16.mxu1 %v2605_v16  ;;  %v1806_v34 = vld [vmem:[%s3793_s1 + $0x158] sm:$0xff] }
  0x4b   : > { %2734 = vmatprep.subr.bf16.mxu0 %v2733_v3  ;;  %2220 = vmatprep.mubr.msk.f32.mxu1 %vm259_vm0, %v3095_v63  ;;  %v2621_v20 = vpack.c.bf16 %v1806_v34, %v1805_v31  ;;  %v1896_v31 = vld [vmem:[%s3793_s1 + $0x3b0] sm:$0xff]  ;;  %v1897_v34 = vld [vmem:[%s3793_s1 + $0x3b8] sm:$0xff] }
  0x4c   : > { %2396 = vmatprep.mubr.f32.mxu0 %v3455_v11  ;;  %2221 = vmatmul.mubr.msk.f32.gmra.mrb[2].mxu1 %vm259_vm0, %v3172_v47  ;;  %v2773_v39 = vpack.c.bf16 %v1897_v34, %v1896_v31 }
  0x4d   : > { %2608 = vmatpush3.bf16.msra.mxu1 %v2605_v16  ;;  %2397 = vmatmul.mubr.f32.gmra.mrb[2].mxu0 %v3460_v35  ;;  %v1808_v16 = vld [vmem:[%s3793_s1 + $0x168] sm:$0xff] }
  0x4e   : > { %2736 = vmatpush3.bf16.msra.mxu0 %v2733_v3  ;;  %2610 = vmatprep.subr.bf16.mxu1 %v2609_v50  ;;  %v2625_v3 = vpack.c.bf16 %v1808_v16, %v1807_v40  ;;  %v1898_v40 = vld [vmem:[%s3793_s1 + $0x3c0] sm:$0xff]  ;;  %v1899_v16 = vld [vmem:[%s3793_s1 + $0x3c8] sm:$0xff] }
  0x4f   : > { %2738 = vmatprep.subr.bf16.mxu0 %v2737_v54  ;;  %2223 = vmatprep.mubr.msk.f32.mxu1 %vm259_vm0, %v3179_v52  ;;  %v2777_v2 = vpack.c.bf16 %v1899_v16, %v1898_v40 }
  0x50   : > { %2399 = vmatprep.mubr.f32.mxu0 %v3485_v48  ;;  %2224 = vmatmul.mubr.msk.f32.gmra.mrb[4].mxu1 %vm259_vm0, %v3197_v61 }
  0x51   : > { %2612 = vmatpush3.bf16.msra.mxu1 %v2609_v50  ;;  %2400 = vmatmul.mubr.f32.gmra.mrb[4].mxu0 %v3490_v5  ;;  %v2757_v50 = vpack.c.bf16 %v1882_v46, %v1881_v4  ;;  %v2781_v46 = vpack.c.bf16 %v1901_v1, %v1900_v59 }
  0x52   : > { %2740 = vmatpush3.bf16.msra.mxu0 %v2737_v54  ;;  %2614 = vmatprep.subr.bf16.mxu1 %v2613_v36  ;;  %v1890_v54 = vld [vmem:[%s3793_s1 + $0x380] sm:$0xff] }
  0x53   : > { %2742 = vmatprep.subr.bf16.mxu0 %v2741_v21  ;;  %2226 = vmatprep.mubr.msk.f32.mxu1 %vm259_vm0, %v3245_v33  ;;  %v2761_v17 = vpack.c.bf16 %v1891_v55, %v1890_v54  ;;  %v1826_v55 = vld [vmem:[%s3793_s1 + $0x1f8] sm:$0xff] }
  0x54   : > { %2402 = vmatprep.mubr.f32.mxu0 %v3515_v22  ;;  %2227 = vmatmul.mubr.msk.f32.gmra.mrb[6].mxu1 %vm259_vm0, %v3284_v24 }
  0x55   : > { %2616 = vmatpush3.bf16.msra.mxu1 %v2613_v36  ;;  %2403 = vmatmul.mubr.f32.gmra.mrb[6].mxu0 %v3518_v29  ;;  %v1893_v36 = vld [vmem:[%s3793_s1 + $0x398] sm:$0xff] }
  0x56   : > { %2744 = vmatpush3.bf16.msra.mxu0 %v2741_v21  ;;  %2618 = vmatprep.subr.bf16.mxu1 %v2617_v28  ;;  %v2765_v10 = vpack.c.bf16 %v1893_v36, %v1892_v58  ;;  %v1815_v21 = vld [vmem:[%s3793_s1 + $0x1a0] sm:$0xff]  ;;  %v1907_v58 = vld [vmem:[%s3793_s1 + $0x408] sm:$0xff] }
  0x57   : > { %2746 = vmatprep.subr.bf16.mxu0 %v2745_v15  ;;  %2261 = vmatprep.mubr.f32.mxu1 %v3530_v32  ;;  %v2641_v13 = vpack.c.bf16 %v1816_v27, %v1815_v21  ;;  %v2793_v36 = vpack.c.bf16 %v1907_v58, %v1906_v56  ;;  %v1910_v27 = vld [vmem:[%s3793_s1 + $0x420] sm:$0xff] }
  0x58   : > { %2437 = vmatprep.mubr.msk.f32.mxu0 %vm259_vm0, %v3095_v63 }
  0x59   : > { %2620 = vmatpush3.bf16.msra.mxu1 %v2617_v28  ;;  %v2769_v28 = vpack.c.bf16 %v1895_v62, %v1894_v60  ;;  %v1911_v60 = vld [vmem:[%s3793_s1 + $0x428] sm:$0xff]  ;;  %v1912_v62 = vld [vmem:[%s3793_s1 + $0x430] sm:$0xff] }
  0x5a   : > { %2748 = vmatpush3.bf16.msra.mxu0 %v2745_v15  ;;  %2622 = vmatprep.subr.bf16.mxu1 %v2621_v20  ;;  %v1818_v15 = vld [vmem:[%s3793_s1 + $0x1b8] sm:$0xff] }
  0x5b   : > { %2750 = vmatprep.subr.bf16.mxu0 %v2749_v26 }
  0x5d   : > { %2624 = vmatpush3.bf16.msra.mxu1 %v2621_v20  ;;  %v1819_v20 = vld [vmem:[%s3793_s1 + $0x1c0] sm:$0xff] }
  0x5e   : > { %2752 = vmatpush3.bf16.msra.mxu0 %v2749_v26  ;;  %2626 = vmatprep.subr.bf16.mxu1 %v2625_v3  ;;  %v1820_v26 = vld [vmem:[%s3793_s1 + $0x1c8] sm:$0xff] }
  0x5f   : > { %2754 = vmatprep.subr.bf16.mxu0 %v2753_v45  ;;  %v2649_v42 = vpack.c.bf16 %v1820_v26, %v1819_v20 }
  0x61   : > { %2628 = vmatpush3.bf16.msra.mxu1 %v2625_v3  ;;  %v1821_v3 = vld [vmem:[%s3793_s1 + $0x1d0] sm:$0xff] }
  0x62   : > { %2756 = vmatpush3.bf16.msra.mxu0 %v2753_v45  ;;  %2630 = vmatprep.subr.bf16.mxu1 %v2629_v49  ;;  %v1822_v45 = vld [vmem:[%s3793_s1 + $0x1d8] sm:$0xff] }
  0x63   : > { %2758 = vmatprep.subr.bf16.mxu0 %v2757_v50  ;;  %v2653_v4 = vpack.c.bf16 %v1822_v45, %v1821_v3 }
  0x65   : > { %2632 = vmatpush3.bf16.msra.mxu1 %v2629_v49  ;;  %v1823_v49 = vld [vmem:[%s3793_s1 + $0x1e0] sm:$0xff] }
  0x66   : > { %2760 = vmatpush3.bf16.msra.mxu0 %v2757_v50  ;;  %2634 = vmatprep.subr.bf16.mxu1 %v2633_v12  ;;  %v1824_v50 = vld [vmem:[%s3793_s1 + $0x1e8] sm:$0xff] }
  0x67   : > { %2762 = vmatprep.subr.bf16.mxu0 %v2761_v17  ;;  %v2657_v53 = vpack.c.bf16 %v1824_v50, %v1823_v49 }
  0x68   : > { %2262 = vmatmul.mubr.f32.vlgmr.msra.gmra.mrb[0].mxu1 %v3377_v44  ;;  %v1817_v44 = vld [vmem:[%s3793_s1 + $0x1b0] sm:$0xff] }
  0x69   : > { %2636 = vmatpush3.bf16.msra.mxu1 %v2633_v12  ;;  %2438 = vmatmul.mubr.msk.f32.vlgmr.msra.gmra.mrb[0].mxu0 %vm259_vm0, %v3172_v47  ;;  %v2645_v37 = vpack.c.bf16 %v1818_v15, %v1817_v44  ;;  %v1904_v12 = vld [vmem:[%s3793_s1 + $0x3f0] sm:$0xff] }
  0x6a   : > { %2764 = vmatpush3.bf16.msra.mxu0 %v2761_v17  ;;  %2638 = vmatprep.subr.bf16.mxu1 %v2637_v9 }
  0x6b   : > { %2766 = vmatprep.subr.bf16.mxu0 %v2765_v10  ;;  %2264 = vmatprep.mubr.f32.mxu1 %v3434_v41 }
  0x6c   : > { %2440 = vmatprep.mubr.msk.f32.mxu0 %vm259_vm0, %v3179_v52  ;;  %2265 = vmatmul.mubr.f32.gmra.mrb[2].mxu1 %v3455_v11 }
  0x6d   : > { %2640 = vmatpush3.bf16.msra.mxu1 %v2637_v9  ;;  %2441 = vmatmul.mubr.msk.f32.gmra.mrb[2].mxu0 %vm259_vm0, %v3197_v61  ;;  %v1908_v9 = vld [vmem:[%s3793_s1 + $0x410] sm:$0xff] }
  0x6e   : > { %2768 = vmatpush3.bf16.msra.mxu0 %v2765_v10  ;;  %2642 = vmatprep.subr.bf16.mxu1 %v2641_v13  ;;  %v1909_v10 = vld [vmem:[%s3793_s1 + $0x418] sm:$0xff] }
  0x6f   : > { %2770 = vmatprep.subr.bf16.mxu0 %v2769_v28  ;;  %2267 = vmatprep.mubr.f32.mxu1 %v3460_v35  ;;  %v2797_v21 = vpack.c.bf16 %v1909_v10, %v1908_v9 }
  0x70   : > { %2443 = vmatprep.mubr.msk.f32.mxu0 %vm259_vm0, %v3245_v33  ;;  %2268 = vmatmul.mubr.f32.gmra.mrb[4].mxu1 %v3485_v48 }
  0x71   : > { %2644 = vmatpush3.bf16.msra.mxu1 %v2641_v13  ;;  %2444 = vmatmul.mubr.msk.f32.gmra.mrb[4].mxu0 %vm259_vm0, %v3284_v24 }
  0x72   : > { %2772 = vmatpush3.bf16.msra.mxu0 %v2769_v28  ;;  %2646 = vmatprep.subr.bf16.mxu1 %v2645_v37 }
  0x73   : > { %2774 = vmatprep.subr.bf16.mxu0 %v2773_v39  ;;  %2270 = vmatprep.mubr.f32.mxu1 %v3490_v5 }
  0x74   : > { %2446 = vmatprep.mubr.msk.f32.mxu0 %vm259_vm0, %v3294_v30  ;;  %2271 = vmatmul.mubr.f32.gmra.mrb[6].mxu1 %v3515_v22 }
  0x75   : > { %2648 = vmatpush3.bf16.msra.mxu1 %v2645_v37  ;;  %2447 = vmatmul.mubr.f32.gmra.mrb[6].mxu0 %v2923_v7  ;;  %v1902_v7 = vld [vmem:[%s3793_s1 + $0x3e0] sm:$0xff] }
  0x76   : > { %2776 = vmatpush3.bf16.msra.mxu0 %v2773_v39  ;;  %2650 = vmatprep.subr.bf16.mxu1 %v2649_v42  ;;  %v2785_v54 = vpack.c.bf16 %v1903_v51, %v1902_v7 }
  0x77   : > { %2778 = vmatprep.subr.bf16.mxu0 %v2777_v2  ;;  %2305 = vmatprep.mubr.msk.f32.mxu1 %vm259_vm0, %v3084_v57  ;;  %v1825_v57 = vld [vmem:[%s3793_s1 + $0x1f0] sm:$0xff] }
  0x78   : > { %2481 = vmatprep.mubr.f32.mxu0 %v3236_v23  ;;  %v1905_v23 = vld [vmem:[%s3793_s1 + $0x3f8] sm:$0xff]  ;;  %v2661_v17 = vpack.c.bf16 %v1826_v55, %v1825_v57 }
  0x79   : > { %2652 = vmatpush3.bf16.msra.mxu1 %v2649_v42  ;;  %v2789_v43 = vpack.c.bf16 %v1905_v23, %v1904_v12 }
  0x7a   : > { %2780 = vmatpush3.bf16.msra.mxu0 %v2777_v2  ;;  %2654 = vmatprep.subr.bf16.mxu1 %v2653_v4 }
  0x7b   : > { %2782 = vmatprep.subr.bf16.mxu0 %v2781_v46 }
  0x7d   : > { %2656 = vmatpush3.bf16.msra.mxu1 %v2653_v4 }
  0x7e   : > { %2784 = vmatpush3.bf16.msra.mxu0 %v2781_v46  ;;  %2658 = vmatprep.subr.bf16.mxu1 %v2657_v53 }
  0x7f   : > { %2786 = vmatprep.subr.bf16.mxu0 %v2785_v54 }
  0x81   : > { %2660 = vmatpush3.bf16.msra.mxu1 %v2657_v53 }
  0x82   : > { %2788 = vmatpush3.bf16.msra.mxu0 %v2785_v54  ;;  %2662 = vmatprep.subr.bf16.mxu1 %v2661_v17 }
  0x83   : > { %2790 = vmatprep.subr.bf16.mxu0 %v2789_v43 }
  0x85   : > { %2664 = vmatpush3.bf16.msra.mxu1 %v2661_v17 }
  0x86   : > { %2792 = vmatpush3.bf16.msra.mxu0 %v2789_v43  ;;  %2825 = vmatprep.subr.bf16.mxu1 %v2793_v36 }
  0x87   : > { %2794 = vmatprep.subr.bf16.mxu0 %v2793_v36 }
  0x88   : > { %2306 = vmatmul.mubr.msk.f32.vlgmr.msra.gmra.mrb[0].mxu1 %vm259_vm0, %v3095_v63  ;;  %v2801_v63 = vpack.c.bf16 %v1911_v60, %v1910_v27 }
  0x89   : > { %2482 = vmatmul.mubr.f32.vlgmr.msra.gmra.mrb[0].mxu0 %v3251_v38  ;;  %2833 = vmatpush3.bf16.msra.mxu1 %v2793_v36  ;;  %v1913_v38 = vld [vmem:[%s3793_s1 + $0x438] sm:$0xff] }
  0x8a   : > { %2796 = vmatpush3.bf16.msra.mxu0 %v2793_v36  ;;  %2308 = vmatprep.mubr.msk.f32.mxu1 %vm259_vm0, %v3172_v47  ;;  %v2805_v47 = vpack.c.bf16 %v1913_v38, %v1912_v62 }
  0x8b   : > { %2484 = vmatprep.mubr.f32.mxu0 %v3273_v19  ;;  %2798 = vmatprep.subr.bf16.mxu0 %v2797_v21  ;;  %v1915_v19 = vld [vmem:[%s3793_s1 + $0x448] sm:$0xff] }
  0x8c   : > { %2309 = vmatmul.mubr.msk.f32.gmra.mrb[2].mxu1 %vm259_vm0, %v3179_v52  ;;  %2826 = vmatprep.subr.bf16.mxu1 %v2797_v21  ;;  %v1914_v52 = vld [vmem:[%s3793_s1 + $0x440] sm:$0xff] }
  0x8d   : > { %2485 = vmatmul.mubr.f32.gmra.mrb[2].mxu0 %v3316_v6  ;;  %2834 = vmatpush3.bf16.msra.mxu1 %v2797_v21  ;;  %v1916_v6 = vld [vmem:[%s3793_s1 + $0x450] sm:$0xff] }
  0x8e   : > { %2800 = vmatpush3.bf16.msra.mxu0 %v2797_v21  ;;  %2311 = vmatprep.mubr.msk.f32.mxu1 %vm259_vm0, %v3197_v61  ;;  %v2809_v61 = vpack.c.bf16 %v1915_v19, %v1914_v52 }
  0x8f   : > { %2487 = vmatprep.mubr.f32.mxu0 %v3327_v0  ;;  %2802 = vmatprep.subr.bf16.mxu0 %v2801_v63  ;;  %v1918_v0 = vld [vmem:[%s3793_s1 + $0x460] sm:$0xff] }
  0x90   : > { %2312 = vmatmul.mubr.msk.f32.gmra.mrb[4].mxu1 %vm259_vm0, %v3245_v33  ;;  %2827 = vmatprep.subr.bf16.mxu1 %v2801_v63  ;;  %v1917_v33 = vld [vmem:[%s3793_s1 + $0x458] sm:$0xff] }
  0x91   : > { %2488 = vmatmul.mubr.f32.gmra.mrb[4].mxu0 %v3353_v14  ;;  %2835 = vmatpush3.bf16.msra.mxu1 %v2801_v63  ;;  %v1919_v14 = vld [vmem:[%s3793_s1 + $0x468] sm:$0xff] }
  0x92   : > { %2804 = vmatpush3.bf16.msra.mxu0 %v2801_v63  ;;  %2314 = vmatprep.mubr.msk.f32.mxu1 %vm259_vm0, %v3284_v24  ;;  %v2813_v24 = vpack.c.bf16 %v1917_v33, %v1916_v6 }
  0x93   : > { %2490 = vmatprep.mubr.f32.mxu0 %v3358_v18  ;;  %2806 = vmatprep.subr.bf16.mxu0 %v2805_v47 }
  0x94   : > { %2315 = vmatmul.mubr.msk.f32.gmra.mrb[6].mxu1 %vm259_vm0, %v3294_v30  ;;  %2828 = vmatprep.subr.bf16.mxu1 %v2805_v47  ;;  %v1921_v30 = vld [vmem:[%s3793_s1 + $0x478] sm:$0xff] }
  0x95   : > { %2491 = vmatmul.mubr.f32.gmra.mrb[6].mxu0 %v2981_v8  ;;  %2836 = vmatpush3.bf16.msra.mxu1 %v2805_v47  ;;  %v2817_v8 = vpack.c.bf16 %v1919_v14, %v1918_v0  ;;  %v2821_v18 = vpack.c.bf16 %v1921_v30, %v1920_v25 }
  0x96   : > { %2808 = vmatpush3.bf16.msra.mxu0 %v2805_v47  ;;  %2829 = vmatprep.subr.bf16.mxu1 %v2809_v61 }
  0x97   : > { %2810 = vmatprep.subr.bf16.mxu0 %v2809_v61  ;;  %2525 = vmatprep.mubr.f32.mxu0 %v3434_v41 }
  0x98   : > { %2531 = vmatprep.mubr.f32.mxu1 %v3490_v5 }
  0x99   : > { %2837 = vmatpush3.bf16.msra.mxu1 %v2809_v61 }
  0x9a   : > { %2812 = vmatpush3.bf16.msra.mxu0 %v2809_v61  ;;  %2830 = vmatprep.subr.bf16.mxu1 %v2813_v24 }
  0x9b   : > { %2814 = vmatprep.subr.bf16.mxu0 %v2813_v24 }
  0x9d   : > { %2838 = vmatpush3.bf16.msra.mxu1 %v2813_v24 }
  0x9e   : > { %2816 = vmatpush3.bf16.msra.mxu0 %v2813_v24  ;;  %2831 = vmatprep.subr.bf16.mxu1 %v2817_v8 }
  0x9f   : > { %2818 = vmatprep.subr.bf16.mxu0 %v2817_v8 }
  0xa1   : > { %2839 = vmatpush3.bf16.msra.mxu1 %v2817_v8 }
  0xa2   : > { %2820 = vmatpush3.bf16.msra.mxu0 %v2817_v8  ;;  %2832 = vmatprep.subr.bf16.mxu1 %v2821_v18 }
  0xa3   : > { %2822 = vmatprep.subr.bf16.mxu0 %v2821_v18 }
  0xa5   : > { %2840 = vmatpush3.bf16.msra.mxu1 %v2821_v18 }
  0xa6   : > { %2824 = vmatpush3.bf16.msra.mxu0 %v2821_v18 }
  0xa8   : > { %2532 = vmatmul.mubr.f32.vlgmr.msra.gmra.mrb[8].mxu1 %v3515_v22 }
  0xa9   : > { %2526 = vmatmul.mubr.f32.vlgmr.msra.gmra.mrb[0].mxu0 %v3455_v11  ;;  %2534 = vmatprep.mubr.f32.mxu1 %v3518_v29 }
  0xaa   : > { %2528 = vmatprep.mubr.f32.mxu0 %v3460_v35 }
  0xac   : > { %2535 = vmatmul.mubr.f32.gmra.mrb[10].mxu1 %v3530_v32 }
  0xad   : > { %2529 = vmatmul.mubr.f32.gmra.mrb[2].mxu0 %v3485_v48 }
 0x15b   : > { %v2307_v41 = vpop.f32.mrb[0].mxu1 }
 0x15c   : > { %v911_v5 = vpop.f32.mrb[1].mxu1 }
 0x15f   : > { %v2310_v13 = vpop.f32.mrb[2].mxu1 }
 0x160   : > { %v921_v28 = vpop.f32.mrb[3].mxu1 }
 0x163   : > { %v2313_v44 = vpop.f32.mrb[4].mxu1 }
 0x164   : > { %v2489_v15 = vpop.f32.mrb[4].mxu0  ;;  %v931_v31 = vpop.f32.mrb[5].mxu1 }
 0x165   : > { %v2845_v34 = vadd.f32 %v2489_v15, %v2313_v44  ;;  %v1467_v22 = vpop.f32.mrb[5].mxu0 }
 0x166   : > { %v2847_v37 = vadd.f32 %v1467_v22, %v931_v31 }
 0x167   : > { %v2316_v11 = vpop.f32.mrb[6].mxu1 }
 0x168   : > { %v2492_v39 = vpop.f32.mrb[6].mxu0  ;;  %v941_v29 = vpop.f32.mrb[7].mxu1 }
 0x169   : > { %v2849_v20 = vadd.f32 %v2492_v39, %v2316_v11  ;;  %v1477_v35 = vpop.f32.mrb[7].mxu0 }
 0x16a   : > { %v2851_v26 = vadd.f32 %v1477_v35, %v941_v29 }
 0x17b   : > { %v2533_v48 = vpop.f32.mrb[8].mxu1 }
 0x17c   : > { %v2527_v32 = vpop.f32.mrb[0].mxu0  ;;  %v2846_v40 = vadd.f32 %v2845_v34, %v2533_v48  ;;  %v1601_v16 = vpop.f32.mrb[9].mxu1 }
 0x17d   : > { %v2841_v42 = vadd.f32 %v2527_v32, %v2307_v41  ;;  %v1581_v2 = vpop.f32.mrb[1].mxu0  ;;  %v2848_v3 = vadd.f32 %v2847_v37, %v1601_v16 }
 0x17e   : > { %1633 = vst [vmem:[%s231_s7 + $0x28] sm:$0xff] %v2846_v40  ;;  %v2842_v45 = vadd.f32 %v1581_v2, %v911_v5  ;;  %v1654_v10 = vmul.f32 %v2846_v40, %v2846_v40 }
 0x17f   : > { %1629 = vst [vmem:[%s231_s7 + $0x8] sm:$0xff] %v2841_v42  ;;  %v1650_v59 = vmul.f32 %v2841_v42, %v2841_v42  ;;  %1632 = vst [vmem:[%s231_s7 + $0x20] sm:$0xff] %v2848_v3  ;;  %v2536_v1 = vpop.f32.mrb[10].mxu1  ;;  %v1653_v58 = vmul.f32 %v2848_v3, %v2848_v3 }
 0x180   : > { %1628 = vst [vmem:[%s231_s7] sm:$0xff] %v2842_v45  ;;  %v1636_v4 = vadd.f32 %v2842_v45, %v2841_v42  ;;  %v1649_v46 = vmul.f32 %v2842_v45, %v2842_v45  ;;  %v2530_v49 = vpop.f32.mrb[2].mxu0  ;;  %v2850_v50 = vadd.f32 %v2849_v20, %v2536_v1  ;;  %v1611_v7 = vpop.f32.mrb[11].mxu1 }
 0x181   : > { %v2843_v51 = vadd.f32 %v2530_v49, %v2310_v13  ;;  %v1591_v53 = vpop.f32.mrb[3].mxu0  ;;  %v2852_v54 = vadd.f32 %v2851_v26, %v1611_v7 }
 0x182   : > { %v1657_v57 = vadd.f32 %v1650_v59, %v1649_v46  ;;  %1635 = vst [vmem:[%s231_s7 + $0x38] sm:$0xff] %v2850_v50  ;;  %v2844_v55 = vadd.f32 %v1591_v53, %v921_v28  ;;  %v1656_v38 = vmul.f32 %v2850_v50, %v2850_v50 }
 0x183   : > { %1631 = vst [vmem:[%s231_s7 + $0x18] sm:$0xff] %v2843_v51  ;;  %1634 = vst [vmem:[%s231_s7 + $0x30] sm:$0xff] %v2852_v54  ;;  %v1652_v17 = vmul.f32 %v2843_v51, %v2843_v51  ;;  %v1655_v63 = vmul.f32 %v2852_v54, %v2852_v54 }
 0x184   : > { %1630 = vst [vmem:[%s231_s7 + $0x10] sm:$0xff] %v2844_v55  ;;  %v1637_v12 = vadd.f32 %v2844_v55, %v1636_v4  ;;  %v1651_v23 = vmul.f32 %v2844_v55, %v2844_v55 }
 0x186   : > { %v1638_v43 = vadd.f32 %v2843_v51, %v1637_v12  ;;  %v1658_v56 = vadd.f32 %v1657_v57, %v1651_v23 }
 0x188   : > { %v1659_v36 = vadd.f32 %v1658_v56, %v1652_v17  ;;  %v1639_v9 = vadd.f32 %v2848_v3, %v1638_v43 }
 0x18a   : > { %v1640_v21 = vadd.f32 %v2846_v40, %v1639_v9  ;;  %v1660_v27 = vadd.f32 %v1659_v36, %v1653_v58 }
 0x18c   : > { %v1641_v60 = vadd.f32 %v2852_v54, %v1640_v21  ;;  %v1661_v62 = vadd.f32 %v1660_v27, %v1654_v10 }
 0x18e   : > { %v1642_v47 = vadd.f32 %v2850_v50, %v1641_v60  ;;  %v1662_v52 = vadd.f32 %v1661_v62, %v1655_v63 }
 0x190   : > { %v1643_v19 = vrot.slane %v1642_v47, 4  ;;  %v1663_v61 = vadd.f32 %v1662_v52, %v1656_v38 }
 0x192   : > { %v1644_v6 = vadd.f32 %v1643_v19, %v1642_v47  ;;  %v1664_v33 = vrot.slane %v1663_v61, 4 }
 0x194   : > { %v1645_v24 = vrot.slane %v1644_v6, 2  ;;  %v1665_v0 = vadd.f32 %v1664_v33, %v1663_v61 }
 0x196   : > { %v1646_v14 = vadd.f32 %v1645_v24, %v1644_v6  ;;  %v1666_v8 = vrot.slane %v1665_v0, 2 }
 0x198   : > { %v1647_v25 = vrot.slane %v1646_v14, 1  ;;  %v1667_v30 = vadd.f32 %v1666_v8, %v1665_v0 }
 0x19a   : > { %v1668_v18 = vrot.slane %v1667_v30, 1  ;;  %v1648_v41 = vadd.f32 %v1647_v25, %v1646_v14 }
 0x19c   : > { %v1669_v5 = vadd.f32 %v1668_v18, %v1667_v30 }
 0x19e   : > { %v1671_v13 = vsel %vm1670_vm4, %v1648_v41, %v1669_v5 }
 0x19f   : > { %v1673_v28 = vsel %vm1672_vm5, %v1671_v13, 0.0 }
 0x1a0   : > { %1674 = vst [vmem:[%s235_s25] sm:$0xff] %v1673_v28 }
 0x1a1 PF: > { %s16_s18 = sadd.s32 1, %s2921_s18  }
 0x1a2   : > { %p13_p4 = scmp.ge.s32.totalorder %s16_s18, 4  }
 0x1a4   :  { %15 = sbr.rel (!%p13_p4) target bundleno = 1 (0x1), region = 86 }

</bundles_post_ra>
